<compile_context>
chip_gen: v6e
topology: v6e:2x2x1
jax: 0.10.0
libtpu: 0.0.40
codegen_flags: <defaults>
</compile_context>

<pallas_src>
import numpy as np
import jax
import jax.numpy as jnp
from jax import lax
from jax.experimental import pallas as pl
from jax.experimental.pallas import tpu as pltpu


def _relu6(v):
    return jnp.minimum(jnp.maximum(v, 0.0), 6.0)


def _fold_params(params):
    """Fold BN scale into conv weights and flatten everything into one f32
    vector (values only); returns (flat_array, static_layout).

    layout[name] = (cout, cin, kd, w_offset, b_offset)
    """
    layout = {}
    chunks = []
    off = 0
    for name, (w, s, b) in params.items():
        w = np.asarray(w, np.float32)
        cout, cin, kd = int(w.shape[0]), int(w.shape[1]), int(w.shape[2])
        w = w.reshape(cout, cin, kd) * np.asarray(s, np.float32)[:, None, None]
        b = np.asarray(b, np.float32).reshape(cout)
        layout[name] = (cout, cin, kd, off, off + cout * cin * kd)
        chunks.append(w.reshape(-1))
        chunks.append(b)
        off += cout * cin * kd + cout
    return np.concatenate(chunks).astype(np.float32), layout


def _pick_hw_tile(depth, hw):
    """Lane-dense HW tile (multiple of 128), capped for vreg pressure."""
    hw_pad128 = ((hw + 127) // 128) * 128
    cap = (8192 // max(depth, 1)) // 128 * 128      # keep D*HW_T <= ~8K f32
    cap = max(128, min(2048, cap))
    hw_t = min(hw_pad128, cap)
    hw_pad = ((hw + hw_t - 1) // hw_t) * hw_t
    return hw_t, hw_pad


def make_inception_kernel(layout, c_in, depth, hw_t):
    """Kernel body. refs: (params_smem, x_vmem, out_vmem)."""

    def kernel(p_ref, x_ref, o_ref):
        # x_ref: (c_in, depth, hw_t)   o_ref: (c_out, depth, hw_t)
        # p_ref: flat f32 SMEM vector of folded weights/biases.

        # Hoisted masks implementing the zero padding of the (3,1,1) convs
        # along D (shared by every cbr3 call).
        row = lax.broadcasted_iota(jnp.int32, (depth, hw_t), 0)
        not_first = row > 0
        not_last = row < depth - 1

        def shift_dm1(x):   # y[d] = x[d-1], zero at d == 0  (XLU roll + select)
            return jnp.where(not_first, pltpu.roll(x, 1, axis=0), 0.0)

        def shift_dp1(x):   # y[d] = x[d+1], zero at d == D-1
            return jnp.where(not_last, pltpu.roll(x, depth - 1, axis=0), 0.0)

        xs = [x_ref[c, :, :] for c in range(c_in)]          # (depth, hw_t) each

        def w_of(name, o, c, k):
            cout, cin, kd, woff, _ = layout[name]
            return p_ref[woff + (o * cin + c) * kd + k]      # SMEM scalar read

        def b_of(name, o):
            _, _, _, _, boff = layout[name]
            return p_ref[boff + o]

        def cbr1(xs_in, name):           # 1x1x1 conv -> folded BN -> ReLU6
            cout, cin, _, _, _ = layout[name]
            out = []
            for o in range(cout):
                acc = w_of(name, o, 0, 0) * xs_in[0]
                for c in range(1, cin):
                    acc = acc + w_of(name, o, c, 0) * xs_in[c]
                out.append(_relu6(acc + b_of(name, o)))
            return out

        def cbr3(xs_in, name):           # (3,1,1) conv, pad (1,0,0) -> BN -> ReLU6
            cout, cin, _, _, _ = layout[name]
            xm1 = [shift_dm1(x) for x in xs_in]
            xp1 = [shift_dp1(x) for x in xs_in]
            out = []
            for o in range(cout):
                acc = None
                for c in range(cin):
                    t = (w_of(name, o, c, 0) * xm1[c]
                         + w_of(name, o, c, 1) * xs_in[c]
                         + w_of(name, o, c, 2) * xp1[c])
                    acc = t if acc is None else acc + t
                out.append(_relu6(acc + b_of(name, o)))
            return out

        def emit(ys, base):
            # Fused residual (`out += x`, channel broadcast when c_in == 1) and
            # final ReLU6; per-branch stores keep live vregs low and overlap
            # writeback with the remaining branch compute.
            for j, y in enumerate(ys):
                res = xs[0] if c_in == 1 else xs[base + j]
                o_ref[base + j, :, :] = _relu6(y + res)

        n0 = layout["b0"][0]
        n1 = layout["b1b"][0]

        emit(cbr1(xs, "b0"), 0)                                     # branch0
        emit(cbr3(cbr1(xs, "b1a"), "b1b"), n0)                      # branch1
        emit(cbr3(cbr3(cbr1(xs, "b2a"), "b2b"), "b2c"), n0 + n1)    # branch2

    return kernel


def inception_block_spectrum(x, params):
    """x: (N, C, D, H, W) float32, PyTorch NCDHW convention."""
    N, C, D, H, W = x.shape
    HW = H * W
    flat_params, layout = _fold_params(params)
    c_out = layout["b0"][0] + layout["b1b"][0] + layout["b2c"][0]
    # Residual `out += x` only matches PyTorch semantics when x broadcasts
    # (C == 1) or matches elementwise (C == c_out).
    assert C == 1 or C == c_out, (
        f"residual `out += x` requires inplanes == 1 or inplanes == planes; "
        f"got C={C}, c_out={c_out}")

    HW_T, HW_pad = _pick_hw_tile(D, HW)

    x4 = x.reshape(N, C, D, HW).astype(jnp.float32)
    if HW_pad != HW:
        # Pad lanes so every output store is an unmasked (lane-dense) vst.
        x4 = jnp.pad(x4, ((0, 0), (0, 0), (0, 0), (0, HW_pad - HW)))

    kernel = make_inception_kernel(layout, C, D, HW_T)

    out = pl.pallas_call(
        kernel,
        out_shape=jax.ShapeDtypeStruct((N, c_out, D, HW_pad), jnp.float32),
        grid_spec=pltpu.PrefetchScalarGridSpec(
            num_scalar_prefetch=0,
            grid=(N, HW_pad // HW_T),
            in_specs=[
                # Tiny folded-weight vector stays whole in SMEM.
                pl.BlockSpec(memory_space=pltpu.MemorySpace.SMEM),
                # None squeezes the size-1 batch dim; kernel refs are (C, D, HW_T).
                pl.BlockSpec((None, C, D, HW_T), lambda n, t: (n, 0, 0, t)),
            ],
            out_specs=pl.BlockSpec((None, c_out, D, HW_T),
                                   lambda n, t: (n, 0, 0, t)),
        ),
        compiler_params=pltpu.CompilerParams(
            dimension_semantics=("parallel", "parallel"),
            vmem_limit_bytes=32 * 1024 * 1024),
    )(jnp.asarray(flat_params), x4)

    if HW_pad != HW:
        out = out[..., :HW]
    return out.reshape(N, c_out, D, H, W)


# ---------------- pure-JAX reference (for verification) ----------------
def ref_forward(x, params):
    def cbr(inp, name, pad_d):
        w, scale, bias = params[name]
        y = lax.conv_general_dilated(
            inp, jnp.asarray(w), window_strides=(1, 1, 1),
            padding=((pad_d, pad_d), (0, 0), (0, 0)),
            dimension_numbers=("NCDHW", "OIDHW", "NCDHW"),
            precision=lax.Precision.HIGHEST)
        y = (y * jnp.asarray(scale)[None, :, None, None, None]
             + jnp.asarray(bias)[None, :, None, None, None])
        return jnp.clip(y, 0.0, 6.0)

    x0 = cbr(x, "b0", 0)
    x1 = cbr(cbr(x, "b1a", 0), "b1b", 1)
    x2 = cbr(cbr(cbr(x, "b2a", 0), "b2b", 1), "b2c", 1)
    out = jnp.concatenate([x0, x1, x2], axis=1) + x   # channel broadcast of x
    return jnp.clip(out, 0.0, 6.0)


if __name__ == "__main__":
    # Only runnable config of the module: inter_planes == inplanes == 1.
    inplanes, planes = 1, 8
    inter = planes // 8
    N, D, H, W = 2, 8, 16, 16

    key = jax.random.PRNGKey(0)
    key, kx = jax.random.split(key)
    x = jax.random.normal(kx, (N, inplanes, D, H, W), jnp.float32)

    def conv_bn_params(k, cout, cin, kd):
        k1, k2, k3, k4, k5 = jax.random.split(k, 5)
        w = jax.random.normal(k1, (cout, cin, kd, 1, 1), jnp.float32) / np.sqrt(cin * kd)
        gamma = 1.0 + 0.1 * jax.random.normal(k2, (cout,), jnp.float32)
        beta = 0.1 * jax.random.normal(k3, (cout,), jnp.float32)
        mean = 0.1 * jax.random.normal(k4, (cout,), jnp.float32)
        var = 0.5 + jnp.abs(jax.random.normal(k5, (cout,), jnp.float32))
        scale = gamma / jnp.sqrt(var + 1e-5)
        bias = beta - mean * scale
        return (np.asarray(w), np.asarray(scale), np.asarray(bias))

    cfg = {
        "b0":  (inter * 2, inplanes,     1),
        "b1a": (inter * 2, inplanes,     1),
        "b1b": (inter * 4, inplanes * 2, 3),
        "b2a": (inter,     inplanes,     1),
        "b2b": (inter * 2, inplanes,     3),
        "b2c": (inter * 2, inter * 2,    3),
    }
    params = {}
    for name, (co, ci, kd) in cfg.items():
        key, sub = jax.random.split(key)
        params[name] = conv_bn_params(sub, co, ci, kd)

    out = inception_block_spectrum(x, params)
    out = jax.block_until_ready(out)

    ref = ref_forward(x, params)
    np.testing.assert_allclose(np.asarray(out), np.asarray(ref), rtol=1e-4, atol=1e-4)
    print("KERNEL_OK")
</pallas_src>

<mosaic_0001>
module attributes {stable_mosaic.version = 11 : i64} {
  func.func @kernel(%arg0: i32, %arg1: i32, %arg2: memref<60xf32, #tpu.memory_space<smem>>, %arg3: memref<1x1x8x256xf32, #tpu.memory_space<vmem>>, %arg4: memref<1x8x8x256xf32, #tpu.memory_space<vmem>>) attributes {dimension_semantics = [#tpu.dimension_semantics<parallel>, #tpu.dimension_semantics<parallel>], iteration_bounds = array<i64: 2, 1>, scalar_prefetch = 0 : i64, scratch_operands = 0 : i64, tpu.core_type = #tpu.core_type<tc>, window_params = [{transform_indices = @transform_0, window_bounds = array<i64: 60>}, {transform_indices = @transform_1, window_bounds = array<i64: 1, 1, 8, 256>}, {transform_indices = @transform_2, window_bounds = array<i64: 1, 8, 8, 256>}]} {
    %0 = tpu.iota {dimensions = array<i32: 0>} : vector<8x256xi32>
    %c0_i32 = arith.constant 0 : i32
    %1 = vector.broadcast %c0_i32 : i32 to vector<8x256xi32>
    %2 = arith.cmpi sgt, %0, %1 : vector<8x256xi32>
    %c7_i32 = arith.constant 7 : i32
    %3 = vector.broadcast %c7_i32 : i32 to vector<8x256xi32>
    %4 = arith.cmpi slt, %0, %3 : vector<8x256xi32>
    %c0 = arith.constant 0 : index
    %c0_0 = arith.constant 0 : index
    %c0_1 = arith.constant 0 : index
    %c0_2 = arith.constant 0 : index
    %5 = vector.load %arg3[%c0, %c0_0, %c0_1, %c0_2] : memref<1x1x8x256xf32, #tpu.memory_space<vmem>>, vector<1x1x8x256xf32>
    %6 = vector.shape_cast %5 : vector<1x1x8x256xf32> to vector<8x256xf32>
    %c0_3 = arith.constant 0 : index
    %7 = memref.load %arg2[%c0_3] : memref<60xf32, #tpu.memory_space<smem>>
    %8 = vector.broadcast %7 : f32 to vector<8x256xf32>
    %9 = arith.mulf %8, %6 : vector<8x256xf32>
    %c2 = arith.constant 2 : index
    %10 = memref.load %arg2[%c2] : memref<60xf32, #tpu.memory_space<smem>>
    %11 = vector.broadcast %10 : f32 to vector<8x256xf32>
    %12 = arith.addf %9, %11 : vector<8x256xf32>
    %cst = arith.constant 0.000000e+00 : f32
    %13 = vector.broadcast %cst : f32 to vector<8x256xf32>
    %14 = arith.maximumf %12, %13 : vector<8x256xf32>
    %cst_4 = arith.constant 6.000000e+00 : f32
    %15 = vector.broadcast %cst_4 : f32 to vector<8x256xf32>
    %16 = arith.minimumf %14, %15 : vector<8x256xf32>
    %c1 = arith.constant 1 : index
    %17 = memref.load %arg2[%c1] : memref<60xf32, #tpu.memory_space<smem>>
    %18 = vector.broadcast %17 : f32 to vector<8x256xf32>
    %19 = arith.mulf %18, %6 : vector<8x256xf32>
    %c3 = arith.constant 3 : index
    %20 = memref.load %arg2[%c3] : memref<60xf32, #tpu.memory_space<smem>>
    %21 = vector.broadcast %20 : f32 to vector<8x256xf32>
    %22 = arith.addf %19, %21 : vector<8x256xf32>
    %cst_5 = arith.constant 0.000000e+00 : f32
    %23 = vector.broadcast %cst_5 : f32 to vector<8x256xf32>
    %24 = arith.maximumf %22, %23 : vector<8x256xf32>
    %cst_6 = arith.constant 6.000000e+00 : f32
    %25 = vector.broadcast %cst_6 : f32 to vector<8x256xf32>
    %26 = arith.minimumf %24, %25 : vector<8x256xf32>
    %27 = arith.addf %16, %6 : vector<8x256xf32>
    %cst_7 = arith.constant 0.000000e+00 : f32
    %28 = vector.broadcast %cst_7 : f32 to vector<8x256xf32>
    %29 = arith.maximumf %27, %28 : vector<8x256xf32>
    %cst_8 = arith.constant 6.000000e+00 : f32
    %30 = vector.broadcast %cst_8 : f32 to vector<8x256xf32>
    %31 = arith.minimumf %29, %30 : vector<8x256xf32>
    %c0_9 = arith.constant 0 : index
    %c0_10 = arith.constant 0 : index
    %c0_11 = arith.constant 0 : index
    %c0_12 = arith.constant 0 : index
    %32 = vector.load %arg4[%c0_9, %c0_10, %c0_11, %c0_12] : memref<1x8x8x256xf32, #tpu.memory_space<vmem>>, vector<1x1x8x256xf32>
    %33 = vector.shape_cast %32 : vector<1x1x8x256xf32> to vector<8x256xf32>
    %34 = vector.shape_cast %31 : vector<8x256xf32> to vector<1x1x8x256xf32>
    tpu.vector_store %arg4[%c0_9, %c0_10, %c0_11, %c0_12], %34 {strides = array<i32>} : memref<1x8x8x256xf32, #tpu.memory_space<vmem>>, vector<1x1x8x256xf32>,
    %35 = arith.addf %26, %6 : vector<8x256xf32>
    %cst_13 = arith.constant 0.000000e+00 : f32
    %36 = vector.broadcast %cst_13 : f32 to vector<8x256xf32>
    %37 = arith.maximumf %35, %36 : vector<8x256xf32>
    %cst_14 = arith.constant 6.000000e+00 : f32
    %38 = vector.broadcast %cst_14 : f32 to vector<8x256xf32>
    %39 = arith.minimumf %37, %38 : vector<8x256xf32>
    %c0_15 = arith.constant 0 : index
    %c1_16 = arith.constant 1 : index
    %c0_17 = arith.constant 0 : index
    %c0_18 = arith.constant 0 : index
    %40 = vector.load %arg4[%c0_15, %c1_16, %c0_17, %c0_18] : memref<1x8x8x256xf32, #tpu.memory_space<vmem>>, vector<1x1x8x256xf32>
    %41 = vector.shape_cast %40 : vector<1x1x8x256xf32> to vector<8x256xf32>
    %42 = vector.shape_cast %39 : vector<8x256xf32> to vector<1x1x8x256xf32>
    tpu.vector_store %arg4[%c0_15, %c1_16, %c0_17, %c0_18], %42 {strides = array<i32>} : memref<1x8x8x256xf32, #tpu.memory_space<vmem>>, vector<1x1x8x256xf32>,
    %c4 = arith.constant 4 : index
    %43 = memref.load %arg2[%c4] : memref<60xf32, #tpu.memory_space<smem>>
    %44 = vector.broadcast %43 : f32 to vector<8x256xf32>
    %45 = arith.mulf %44, %6 : vector<8x256xf32>
    %c6 = arith.constant 6 : index
    %46 = memref.load %arg2[%c6] : memref<60xf32, #tpu.memory_space<smem>>
    %47 = vector.broadcast %46 : f32 to vector<8x256xf32>
    %48 = arith.addf %45, %47 : vector<8x256xf32>
    %cst_19 = arith.constant 0.000000e+00 : f32
    %49 = vector.broadcast %cst_19 : f32 to vector<8x256xf32>
    %50 = arith.maximumf %48, %49 : vector<8x256xf32>
    %cst_20 = arith.constant 6.000000e+00 : f32
    %51 = vector.broadcast %cst_20 : f32 to vector<8x256xf32>
    %52 = arith.minimumf %50, %51 : vector<8x256xf32>
    %c5 = arith.constant 5 : index
    %53 = memref.load %arg2[%c5] : memref<60xf32, #tpu.memory_space<smem>>
    %54 = vector.broadcast %53 : f32 to vector<8x256xf32>
    %55 = arith.mulf %54, %6 : vector<8x256xf32>
    %c7 = arith.constant 7 : index
    %56 = memref.load %arg2[%c7] : memref<60xf32, #tpu.memory_space<smem>>
    %57 = vector.broadcast %56 : f32 to vector<8x256xf32>
    %58 = arith.addf %55, %57 : vector<8x256xf32>
    %cst_21 = arith.constant 0.000000e+00 : f32
    %59 = vector.broadcast %cst_21 : f32 to vector<8x256xf32>
    %60 = arith.maximumf %58, %59 : vector<8x256xf32>
    %cst_22 = arith.constant 6.000000e+00 : f32
    %61 = vector.broadcast %cst_22 : f32 to vector<8x256xf32>
    %62 = arith.minimumf %60, %61 : vector<8x256xf32>
    %c1_i32 = arith.constant 1 : i32
    %63 = tpu.dynamic_rotate %52 by %c1_i32 dim 0 : vector<8x256xf32>, i32 -> vector<8x256xf32>
    %cst_23 = arith.constant 0.000000e+00 : f32
    %64 = vector.broadcast %cst_23 : f32 to vector<8x256xf32>
    %65 = arith.select %2, %63, %64 : vector<8x256xi1>, vector<8x256xf32>
    %c1_i32_24 = arith.constant 1 : i32
    %66 = tpu.dynamic_rotate %62 by %c1_i32_24 dim 0 : vector<8x256xf32>, i32 -> vector<8x256xf32>
    %cst_25 = arith.constant 0.000000e+00 : f32
    %67 = vector.broadcast %cst_25 : f32 to vector<8x256xf32>
    %68 = arith.select %2, %66, %67 : vector<8x256xi1>, vector<8x256xf32>
    %c7_i32_26 = arith.constant 7 : i32
    %69 = tpu.dynamic_rotate %52 by %c7_i32_26 dim 0 : vector<8x256xf32>, i32 -> vector<8x256xf32>
    %cst_27 = arith.constant 0.000000e+00 : f32
    %70 = vector.broadcast %cst_27 : f32 to vector<8x256xf32>
    %71 = arith.select %4, %69, %70 : vector<8x256xi1>, vector<8x256xf32>
    %c7_i32_28 = arith.constant 7 : i32
    %72 = tpu.dynamic_rotate %62 by %c7_i32_28 dim 0 : vector<8x256xf32>, i32 -> vector<8x256xf32>
    %cst_29 = arith.constant 0.000000e+00 : f32
    %73 = vector.broadcast %cst_29 : f32 to vector<8x256xf32>
    %74 = arith.select %4, %72, %73 : vector<8x256xi1>, vector<8x256xf32>
    %c8 = arith.constant 8 : index
    %75 = memref.load %arg2[%c8] : memref<60xf32, #tpu.memory_space<smem>>
    %76 = vector.broadcast %75 : f32 to vector<8x256xf32>
    %77 = arith.mulf %76, %65 : vector<8x256xf32>
    %c9 = arith.constant 9 : index
    %78 = memref.load %arg2[%c9] : memref<60xf32, #tpu.memory_space<smem>>
    %79 = vector.broadcast %78 : f32 to vector<8x256xf32>
    %80 = arith.mulf %79, %52 : vector<8x256xf32>
    %81 = arith.addf %77, %80 : vector<8x256xf32>
    %c10 = arith.constant 10 : index
    %82 = memref.load %arg2[%c10] : memref<60xf32, #tpu.memory_space<smem>>
    %83 = vector.broadcast %82 : f32 to vector<8x256xf32>
    %84 = arith.mulf %83, %71 : vector<8x256xf32>
    %85 = arith.addf %81, %84 : vector<8x256xf32>
    %c11 = arith.constant 11 : index
    %86 = memref.load %arg2[%c11] : memref<60xf32, #tpu.memory_space<smem>>
    %87 = vector.broadcast %86 : f32 to vector<8x256xf32>
    %88 = arith.mulf %87, %68 : vector<8x256xf32>
    %c12 = arith.constant 12 : index
    %89 = memref.load %arg2[%c12] : memref<60xf32, #tpu.memory_space<smem>>
    %90 = vector.broadcast %89 : f32 to vector<8x256xf32>
    %91 = arith.mulf %90, %62 : vector<8x256xf32>
    %92 = arith.addf %88, %91 : vector<8x256xf32>
    %c13 = arith.constant 13 : index
    %93 = memref.load %arg2[%c13] : memref<60xf32, #tpu.memory_space<smem>>
    %94 = vector.broadcast %93 : f32 to vector<8x256xf32>
    %95 = arith.mulf %94, %74 : vector<8x256xf32>
    %96 = arith.addf %92, %95 : vector<8x256xf32>
    %97 = arith.addf %85, %96 : vector<8x256xf32>
    %c32 = arith.constant 32 : index
    %98 = memref.load %arg2[%c32] : memref<60xf32, #tpu.memory_space<smem>>
    %99 = vector.broadcast %98 : f32 to vector<8x256xf32>
    %100 = arith.addf %97, %99 : vector<8x256xf32>
    %cst_30 = arith.constant 0.000000e+00 : f32
    %101 = vector.broadcast %cst_30 : f32 to vector<8x256xf32>
    %102 = arith.maximumf %100, %101 : vector<8x256xf32>
    %cst_31 = arith.constant 6.000000e+00 : f32
    %103 = vector.broadcast %cst_31 : f32 to vector<8x256xf32>
    %104 = arith.minimumf %102, %103 : vector<8x256xf32>
    %c14 = arith.constant 14 : index
    %105 = memref.load %arg2[%c14] : memref<60xf32, #tpu.memory_space<smem>>
    %106 = vector.broadcast %105 : f32 to vector<8x256xf32>
    %107 = arith.mulf %106, %65 : vector<8x256xf32>
    %c15 = arith.constant 15 : index
    %108 = memref.load %arg2[%c15] : memref<60xf32, #tpu.memory_space<smem>>
    %109 = vector.broadcast %108 : f32 to vector<8x256xf32>
    %110 = arith.mulf %109, %52 : vector<8x256xf32>
    %111 = arith.addf %107, %110 : vector<8x256xf32>
    %c16 = arith.constant 16 : index
    %112 = memref.load %arg2[%c16] : memref<60xf32, #tpu.memory_space<smem>>
    %113 = vector.broadcast %112 : f32 to vector<8x256xf32>
    %114 = arith.mulf %113, %71 : vector<8x256xf32>
    %115 = arith.addf %111, %114 : vector<8x256xf32>
    %c17 = arith.constant 17 : index
    %116 = memref.load %arg2[%c17] : memref<60xf32, #tpu.memory_space<smem>>
    %117 = vector.broadcast %116 : f32 to vector<8x256xf32>
    %118 = arith.mulf %117, %68 : vector<8x256xf32>
    %c18 = arith.constant 18 : index
    %119 = memref.load %arg2[%c18] : memref<60xf32, #tpu.memory_space<smem>>
    %120 = vector.broadcast %119 : f32 to vector<8x256xf32>
    %121 = arith.mulf %120, %62 : vector<8x256xf32>
    %122 = arith.addf %118, %121 : vector<8x256xf32>
    %c19 = arith.constant 19 : index
    %123 = memref.load %arg2[%c19] : memref<60xf32, #tpu.memory_space<smem>>
    %124 = vector.broadcast %123 : f32 to vector<8x256xf32>
    %125 = arith.mulf %124, %74 : vector<8x256xf32>
    %126 = arith.addf %122, %125 : vector<8x256xf32>
    %127 = arith.addf %115, %126 : vector<8x256xf32>
    %c33 = arith.constant 33 : index
    %128 = memref.load %arg2[%c33] : memref<60xf32, #tpu.memory_space<smem>>
    %129 = vector.broadcast %128 : f32 to vector<8x256xf32>
    %130 = arith.addf %127, %129 : vector<8x256xf32>
    %cst_32 = arith.constant 0.000000e+00 : f32
    %131 = vector.broadcast %cst_32 : f32 to vector<8x256xf32>
    %132 = arith.maximumf %130, %131 : vector<8x256xf32>
    %cst_33 = arith.constant 6.000000e+00 : f32
    %133 = vector.broadcast %cst_33 : f32 to vector<8x256xf32>
    %134 = arith.minimumf %132, %133 : vector<8x256xf32>
    %c20 = arith.constant 20 : index
    %135 = memref.load %arg2[%c20] : memref<60xf32, #tpu.memory_space<smem>>
    %136 = vector.broadcast %135 : f32 to vector<8x256xf32>
    %137 = arith.mulf %136, %65 : vector<8x256xf32>
    %c21 = arith.constant 21 : index
    %138 = memref.load %arg2[%c21] : memref<60xf32, #tpu.memory_space<smem>>
    %139 = vector.broadcast %138 : f32 to vector<8x256xf32>
    %140 = arith.mulf %139, %52 : vector<8x256xf32>
    %141 = arith.addf %137, %140 : vector<8x256xf32>
    %c22 = arith.constant 22 : index
    %142 = memref.load %arg2[%c22] : memref<60xf32, #tpu.memory_space<smem>>
    %143 = vector.broadcast %142 : f32 to vector<8x256xf32>
    %144 = arith.mulf %143, %71 : vector<8x256xf32>
    %145 = arith.addf %141, %144 : vector<8x256xf32>
    %c23 = arith.constant 23 : index
    %146 = memref.load %arg2[%c23] : memref<60xf32, #tpu.memory_space<smem>>
    %147 = vector.broadcast %146 : f32 to vector<8x256xf32>
    %148 = arith.mulf %147, %68 : vector<8x256xf32>
    %c24 = arith.constant 24 : index
    %149 = memref.load %arg2[%c24] : memref<60xf32, #tpu.memory_space<smem>>
    %150 = vector.broadcast %149 : f32 to vector<8x256xf32>
    %151 = arith.mulf %150, %62 : vector<8x256xf32>
    %152 = arith.addf %148, %151 : vector<8x256xf32>
    %c25 = arith.constant 25 : index
    %153 = memref.load %arg2[%c25] : memref<60xf32, #tpu.memory_space<smem>>
    %154 = vector.broadcast %153 : f32 to vector<8x256xf32>
    %155 = arith.mulf %154, %74 : vector<8x256xf32>
    %156 = arith.addf %152, %155 : vector<8x256xf32>
    %157 = arith.addf %145, %156 : vector<8x256xf32>
    %c34 = arith.constant 34 : index
    %158 = memref.load %arg2[%c34] : memref<60xf32, #tpu.memory_space<smem>>
    %159 = vector.broadcast %158 : f32 to vector<8x256xf32>
    %160 = arith.addf %157, %159 : vector<8x256xf32>
    %cst_34 = arith.constant 0.000000e+00 : f32
    %161 = vector.broadcast %cst_34 : f32 to vector<8x256xf32>
    %162 = arith.maximumf %160, %161 : vector<8x256xf32>
    %cst_35 = arith.constant 6.000000e+00 : f32
    %163 = vector.broadcast %cst_35 : f32 to vector<8x256xf32>
    %164 = arith.minimumf %162, %163 : vector<8x256xf32>
    %c26 = arith.constant 26 : index
    %165 = memref.load %arg2[%c26] : memref<60xf32, #tpu.memory_space<smem>>
    %166 = vector.broadcast %165 : f32 to vector<8x256xf32>
    %167 = arith.mulf %166, %65 : vector<8x256xf32>
    %c27 = arith.constant 27 : index
    %168 = memref.load %arg2[%c27] : memref<60xf32, #tpu.memory_space<smem>>
    %169 = vector.broadcast %168 : f32 to vector<8x256xf32>
    %170 = arith.mulf %169, %52 : vector<8x256xf32>
    %171 = arith.addf %167, %170 : vector<8x256xf32>
    %c28 = arith.constant 28 : index
    %172 = memref.load %arg2[%c28] : memref<60xf32, #tpu.memory_space<smem>>
    %173 = vector.broadcast %172 : f32 to vector<8x256xf32>
    %174 = arith.mulf %173, %71 : vector<8x256xf32>
    %175 = arith.addf %171, %174 : vector<8x256xf32>
    %c29 = arith.constant 29 : index
    %176 = memref.load %arg2[%c29] : memref<60xf32, #tpu.memory_space<smem>>
    %177 = vector.broadcast %176 : f32 to vector<8x256xf32>
    %178 = arith.mulf %177, %68 : vector<8x256xf32>
    %c30 = arith.constant 30 : index
    %179 = memref.load %arg2[%c30] : memref<60xf32, #tpu.memory_space<smem>>
    %180 = vector.broadcast %179 : f32 to vector<8x256xf32>
    %181 = arith.mulf %180, %62 : vector<8x256xf32>
    %182 = arith.addf %178, %181 : vector<8x256xf32>
    %c31 = arith.constant 31 : index
    %183 = memref.load %arg2[%c31] : memref<60xf32, #tpu.memory_space<smem>>
    %184 = vector.broadcast %183 : f32 to vector<8x256xf32>
    %185 = arith.mulf %184, %74 : vector<8x256xf32>
    %186 = arith.addf %182, %185 : vector<8x256xf32>
    %187 = arith.addf %175, %186 : vector<8x256xf32>
    %c35 = arith.constant 35 : index
    %188 = memref.load %arg2[%c35] : memref<60xf32, #tpu.memory_space<smem>>
    %189 = vector.broadcast %188 : f32 to vector<8x256xf32>
    %190 = arith.addf %187, %189 : vector<8x256xf32>
    %cst_36 = arith.constant 0.000000e+00 : f32
    %191 = vector.broadcast %cst_36 : f32 to vector<8x256xf32>
    %192 = arith.maximumf %190, %191 : vector<8x256xf32>
    %cst_37 = arith.constant 6.000000e+00 : f32
    %193 = vector.broadcast %cst_37 : f32 to vector<8x256xf32>
    %194 = arith.minimumf %192, %193 : vector<8x256xf32>
    %195 = arith.addf %104, %6 : vector<8x256xf32>
    %cst_38 = arith.constant 0.000000e+00 : f32
    %196 = vector.broadcast %cst_38 : f32 to vector<8x256xf32>
    %197 = arith.maximumf %195, %196 : vector<8x256xf32>
    %cst_39 = arith.constant 6.000000e+00 : f32
    %198 = vector.broadcast %cst_39 : f32 to vector<8x256xf32>
    %199 = arith.minimumf %197, %198 : vector<8x256xf32>
    %c0_40 = arith.constant 0 : index
    %c2_41 = arith.constant 2 : index
    %c0_42 = arith.constant 0 : index
    %c0_43 = arith.constant 0 : index
    %200 = vector.load %arg4[%c0_40, %c2_41, %c0_42, %c0_43] : memref<1x8x8x256xf32, #tpu.memory_space<vmem>>, vector<1x1x8x256xf32>
    %201 = vector.shape_cast %200 : vector<1x1x8x256xf32> to vector<8x256xf32>
    %202 = vector.shape_cast %199 : vector<8x256xf32> to vector<1x1x8x256xf32>
    tpu.vector_store %arg4[%c0_40, %c2_41, %c0_42, %c0_43], %202 {strides = array<i32>} : memref<1x8x8x256xf32, #tpu.memory_space<vmem>>, vector<1x1x8x256xf32>,
    %203 = arith.addf %134, %6 : vector<8x256xf32>
    %cst_44 = arith.constant 0.000000e+00 : f32
    %204 = vector.broadcast %cst_44 : f32 to vector<8x256xf32>
    %205 = arith.maximumf %203, %204 : vector<8x256xf32>
    %cst_45 = arith.constant 6.000000e+00 : f32
    %206 = vector.broadcast %cst_45 : f32 to vector<8x256xf32>
    %207 = arith.minimumf %205, %206 : vector<8x256xf32>
    %c0_46 = arith.constant 0 : index
    %c3_47 = arith.constant 3 : index
    %c0_48 = arith.constant 0 : index
    %c0_49 = arith.constant 0 : index
    %208 = vector.load %arg4[%c0_46, %c3_47, %c0_48, %c0_49] : memref<1x8x8x256xf32, #tpu.memory_space<vmem>>, vector<1x1x8x256xf32>
    %209 = vector.shape_cast %208 : vector<1x1x8x256xf32> to vector<8x256xf32>
    %210 = vector.shape_cast %207 : vector<8x256xf32> to vector<1x1x8x256xf32>
    tpu.vector_store %arg4[%c0_46, %c3_47, %c0_48, %c0_49], %210 {strides = array<i32>} : memref<1x8x8x256xf32, #tpu.memory_space<vmem>>, vector<1x1x8x256xf32>,
    %211 = arith.addf %164, %6 : vector<8x256xf32>
    %cst_50 = arith.constant 0.000000e+00 : f32
    %212 = vector.broadcast %cst_50 : f32 to vector<8x256xf32>
    %213 = arith.maximumf %211, %212 : vector<8x256xf32>
    %cst_51 = arith.constant 6.000000e+00 : f32
    %214 = vector.broadcast %cst_51 : f32 to vector<8x256xf32>
    %215 = arith.minimumf %213, %214 : vector<8x256xf32>
    %c0_52 = arith.constant 0 : index
    %c4_53 = arith.constant 4 : index
    %c0_54 = arith.constant 0 : index
    %c0_55 = arith.constant 0 : index
    %216 = vector.load %arg4[%c0_52, %c4_53, %c0_54, %c0_55] : memref<1x8x8x256xf32, #tpu.memory_space<vmem>>, vector<1x1x8x256xf32>
    %217 = vector.shape_cast %216 : vector<1x1x8x256xf32> to vector<8x256xf32>
    %218 = vector.shape_cast %215 : vector<8x256xf32> to vector<1x1x8x256xf32>
    tpu.vector_store %arg4[%c0_52, %c4_53, %c0_54, %c0_55], %218 {strides = array<i32>} : memref<1x8x8x256xf32, #tpu.memory_space<vmem>>, vector<1x1x8x256xf32>,
    %219 = arith.addf %194, %6 : vector<8x256xf32>
    %cst_56 = arith.constant 0.000000e+00 : f32
    %220 = vector.broadcast %cst_56 : f32 to vector<8x256xf32>
    %221 = arith.maximumf %219, %220 : vector<8x256xf32>
    %cst_57 = arith.constant 6.000000e+00 : f32
    %222 = vector.broadcast %cst_57 : f32 to vector<8x256xf32>
    %223 = arith.minimumf %221, %222 : vector<8x256xf32>
    %c0_58 = arith.constant 0 : index
    %c5_59 = arith.constant 5 : index
    %c0_60 = arith.constant 0 : index
    %c0_61 = arith.constant 0 : index
    %224 = vector.load %arg4[%c0_58, %c5_59, %c0_60, %c0_61] : memref<1x8x8x256xf32, #tpu.memory_space<vmem>>, vector<1x1x8x256xf32>
    %225 = vector.shape_cast %224 : vector<1x1x8x256xf32> to vector<8x256xf32>
    %226 = vector.shape_cast %223 : vector<8x256xf32> to vector<1x1x8x256xf32>
    tpu.vector_store %arg4[%c0_58, %c5_59, %c0_60, %c0_61], %226 {strides = array<i32>} : memref<1x8x8x256xf32, #tpu.memory_space<vmem>>, vector<1x1x8x256xf32>,
    %c36 = arith.constant 36 : index
    %227 = memref.load %arg2[%c36] : memref<60xf32, #tpu.memory_space<smem>>
    %228 = vector.broadcast %227 : f32 to vector<8x256xf32>
    %229 = arith.mulf %228, %6 : vector<8x256xf32>
    %c37 = arith.constant 37 : index
    %230 = memref.load %arg2[%c37] : memref<60xf32, #tpu.memory_space<smem>>
    %231 = vector.broadcast %230 : f32 to vector<8x256xf32>
    %232 = arith.addf %229, %231 : vector<8x256xf32>
    %cst_62 = arith.constant 0.000000e+00 : f32
    %233 = vector.broadcast %cst_62 : f32 to vector<8x256xf32>
    %234 = arith.maximumf %232, %233 : vector<8x256xf32>
    %cst_63 = arith.constant 6.000000e+00 : f32
    %235 = vector.broadcast %cst_63 : f32 to vector<8x256xf32>
    %236 = arith.minimumf %234, %235 : vector<8x256xf32>
    %c1_i32_64 = arith.constant 1 : i32
    %237 = tpu.dynamic_rotate %236 by %c1_i32_64 dim 0 : vector<8x256xf32>, i32 -> vector<8x256xf32>
    %cst_65 = arith.constant 0.000000e+00 : f32
    %238 = vector.broadcast %cst_65 : f32 to vector<8x256xf32>
    %239 = arith.select %2, %237, %238 : vector<8x256xi1>, vector<8x256xf32>
    %c7_i32_66 = arith.constant 7 : i32
    %240 = tpu.dynamic_rotate %236 by %c7_i32_66 dim 0 : vector<8x256xf32>, i32 -> vector<8x256xf32>
    %cst_67 = arith.constant 0.000000e+00 : f32
    %241 = vector.broadcast %cst_67 : f32 to vector<8x256xf32>
    %242 = arith.select %4, %240, %241 : vector<8x256xi1>, vector<8x256xf32>
    %c38 = arith.constant 38 : index
    %243 = memref.load %arg2[%c38] : memref<60xf32, #tpu.memory_space<smem>>
    %244 = vector.broadcast %243 : f32 to vector<8x256xf32>
    %245 = arith.mulf %244, %239 : vector<8x256xf32>
    %c39 = arith.constant 39 : index
    %246 = memref.load %arg2[%c39] : memref<60xf32, #tpu.memory_space<smem>>
    %247 = vector.broadcast %246 : f32 to vector<8x256xf32>
    %248 = arith.mulf %247, %236 : vector<8x256xf32>
    %249 = arith.addf %245, %248 : vector<8x256xf32>
    %c40 = arith.constant 40 : index
    %250 = memref.load %arg2[%c40] : memref<60xf32, #tpu.memory_space<smem>>
    %251 = vector.broadcast %250 : f32 to vector<8x256xf32>
    %252 = arith.mulf %251, %242 : vector<8x256xf32>
    %253 = arith.addf %249, %252 : vector<8x256xf32>
    %c44 = arith.constant 44 : index
    %254 = memref.load %arg2[%c44] : memref<60xf32, #tpu.memory_space<smem>>
    %255 = vector.broadcast %254 : f32 to vector<8x256xf32>
    %256 = arith.addf %253, %255 : vector<8x256xf32>
    %cst_68 = arith.constant 0.000000e+00 : f32
    %257 = vector.broadcast %cst_68 : f32 to vector<8x256xf32>
    %258 = arith.maximumf %256, %257 : vector<8x256xf32>
    %cst_69 = arith.constant 6.000000e+00 : f32
    %259 = vector.broadcast %cst_69 : f32 to vector<8x256xf32>
    %260 = arith.minimumf %258, %259 : vector<8x256xf32>
    %c41 = arith.constant 41 : index
    %261 = memref.load %arg2[%c41] : memref<60xf32, #tpu.memory_space<smem>>
    %262 = vector.broadcast %261 : f32 to vector<8x256xf32>
    %263 = arith.mulf %262, %239 : vector<8x256xf32>
    %c42 = arith.constant 42 : index
    %264 = memref.load %arg2[%c42] : memref<60xf32, #tpu.memory_space<smem>>
    %265 = vector.broadcast %264 : f32 to vector<8x256xf32>
    %266 = arith.mulf %265, %236 : vector<8x256xf32>
    %267 = arith.addf %263, %266 : vector<8x256xf32>
    %c43 = arith.constant 43 : index
    %268 = memref.load %arg2[%c43] : memref<60xf32, #tpu.memory_space<smem>>
    %269 = vector.broadcast %268 : f32 to vector<8x256xf32>
    %270 = arith.mulf %269, %242 : vector<8x256xf32>
    %271 = arith.addf %267, %270 : vector<8x256xf32>
    %c45 = arith.constant 45 : index
    %272 = memref.load %arg2[%c45] : memref<60xf32, #tpu.memory_space<smem>>
    %273 = vector.broadcast %272 : f32 to vector<8x256xf32>
    %274 = arith.addf %271, %273 : vector<8x256xf32>
    %cst_70 = arith.constant 0.000000e+00 : f32
    %275 = vector.broadcast %cst_70 : f32 to vector<8x256xf32>
    %276 = arith.maximumf %274, %275 : vector<8x256xf32>
    %cst_71 = arith.constant 6.000000e+00 : f32
    %277 = vector.broadcast %cst_71 : f32 to vector<8x256xf32>
    %278 = arith.minimumf %276, %277 : vector<8x256xf32>
    %c1_i32_72 = arith.constant 1 : i32
    %279 = tpu.dynamic_rotate %260 by %c1_i32_72 dim 0 : vector<8x256xf32>, i32 -> vector<8x256xf32>
    %cst_73 = arith.constant 0.000000e+00 : f32
    %280 = vector.broadcast %cst_73 : f32 to vector<8x256xf32>
    %281 = arith.select %2, %279, %280 : vector<8x256xi1>, vector<8x256xf32>
    %c1_i32_74 = arith.constant 1 : i32
    %282 = tpu.dynamic_rotate %278 by %c1_i32_74 dim 0 : vector<8x256xf32>, i32 -> vector<8x256xf32>
    %cst_75 = arith.constant 0.000000e+00 : f32
    %283 = vector.broadcast %cst_75 : f32 to vector<8x256xf32>
    %284 = arith.select %2, %282, %283 : vector<8x256xi1>, vector<8x256xf32>
    %c7_i32_76 = arith.constant 7 : i32
    %285 = tpu.dynamic_rotate %260 by %c7_i32_76 dim 0 : vector<8x256xf32>, i32 -> vector<8x256xf32>
    %cst_77 = arith.constant 0.000000e+00 : f32
    %286 = vector.broadcast %cst_77 : f32 to vector<8x256xf32>
    %287 = arith.select %4, %285, %286 : vector<8x256xi1>, vector<8x256xf32>
    %c7_i32_78 = arith.constant 7 : i32
    %288 = tpu.dynamic_rotate %278 by %c7_i32_78 dim 0 : vector<8x256xf32>, i32 -> vector<8x256xf32>
    %cst_79 = arith.constant 0.000000e+00 : f32
    %289 = vector.broadcast %cst_79 : f32 to vector<8x256xf32>
    %290 = arith.select %4, %288, %289 : vector<8x256xi1>, vector<8x256xf32>
    %c46 = arith.constant 46 : index
    %291 = memref.load %arg2[%c46] : memref<60xf32, #tpu.memory_space<smem>>
    %292 = vector.broadcast %291 : f32 to vector<8x256xf32>
    %293 = arith.mulf %292, %281 : vector<8x256xf32>
    %c47 = arith.constant 47 : index
    %294 = memref.load %arg2[%c47] : memref<60xf32, #tpu.memory_space<smem>>
    %295 = vector.broadcast %294 : f32 to vector<8x256xf32>
    %296 = arith.mulf %295, %260 : vector<8x256xf32>
    %297 = arith.addf %293, %296 : vector<8x256xf32>
    %c48 = arith.constant 48 : index
    %298 = memref.load %arg2[%c48] : memref<60xf32, #tpu.memory_space<smem>>
    %299 = vector.broadcast %298 : f32 to vector<8x256xf32>
    %300 = arith.mulf %299, %287 : vector<8x256xf32>
    %301 = arith.addf %297, %300 : vector<8x256xf32>
    %c49 = arith.constant 49 : index
    %302 = memref.load %arg2[%c49] : memref<60xf32, #tpu.memory_space<smem>>
    %303 = vector.broadcast %302 : f32 to vector<8x256xf32>
    %304 = arith.mulf %303, %284 : vector<8x256xf32>
    %c50 = arith.constant 50 : index
    %305 = memref.load %arg2[%c50] : memref<60xf32, #tpu.memory_space<smem>>
    %306 = vector.broadcast %305 : f32 to vector<8x256xf32>
    %307 = arith.mulf %306, %278 : vector<8x256xf32>
    %308 = arith.addf %304, %307 : vector<8x256xf32>
    %c51 = arith.constant 51 : index
    %309 = memref.load %arg2[%c51] : memref<60xf32, #tpu.memory_space<smem>>
    %310 = vector.broadcast %309 : f32 to vector<8x256xf32>
    %311 = arith.mulf %310, %290 : vector<8x256xf32>
    %312 = arith.addf %308, %311 : vector<8x256xf32>
    %313 = arith.addf %301, %312 : vector<8x256xf32>
    %c58 = arith.constant 58 : index
    %314 = memref.load %arg2[%c58] : memref<60xf32, #tpu.memory_space<smem>>
    %315 = vector.broadcast %314 : f32 to vector<8x256xf32>
    %316 = arith.addf %313, %315 : vector<8x256xf32>
    %cst_80 = arith.constant 0.000000e+00 : f32
    %317 = vector.broadcast %cst_80 : f32 to vector<8x256xf32>
    %318 = arith.maximumf %316, %317 : vector<8x256xf32>
    %cst_81 = arith.constant 6.000000e+00 : f32
    %319 = vector.broadcast %cst_81 : f32 to vector<8x256xf32>
    %320 = arith.minimumf %318, %319 : vector<8x256xf32>
    %c52 = arith.constant 52 : index
    %321 = memref.load %arg2[%c52] : memref<60xf32, #tpu.memory_space<smem>>
    %322 = vector.broadcast %321 : f32 to vector<8x256xf32>
    %323 = arith.mulf %322, %281 : vector<8x256xf32>
    %c53 = arith.constant 53 : index
    %324 = memref.load %arg2[%c53] : memref<60xf32, #tpu.memory_space<smem>>
    %325 = vector.broadcast %324 : f32 to vector<8x256xf32>
    %326 = arith.mulf %325, %260 : vector<8x256xf32>
    %327 = arith.addf %323, %326 : vector<8x256xf32>
    %c54 = arith.constant 54 : index
    %328 = memref.load %arg2[%c54] : memref<60xf32, #tpu.memory_space<smem>>
    %329 = vector.broadcast %328 : f32 to vector<8x256xf32>
    %330 = arith.mulf %329, %287 : vector<8x256xf32>
    %331 = arith.addf %327, %330 : vector<8x256xf32>
    %c55 = arith.constant 55 : index
    %332 = memref.load %arg2[%c55] : memref<60xf32, #tpu.memory_space<smem>>
    %333 = vector.broadcast %332 : f32 to vector<8x256xf32>
    %334 = arith.mulf %333, %284 : vector<8x256xf32>
    %c56 = arith.constant 56 : index
    %335 = memref.load %arg2[%c56] : memref<60xf32, #tpu.memory_space<smem>>
    %336 = vector.broadcast %335 : f32 to vector<8x256xf32>
    %337 = arith.mulf %336, %278 : vector<8x256xf32>
    %338 = arith.addf %334, %337 : vector<8x256xf32>
    %c57 = arith.constant 57 : index
    %339 = memref.load %arg2[%c57] : memref<60xf32, #tpu.memory_space<smem>>
    %340 = vector.broadcast %339 : f32 to vector<8x256xf32>
    %341 = arith.mulf %340, %290 : vector<8x256xf32>
    %342 = arith.addf %338, %341 : vector<8x256xf32>
    %343 = arith.addf %331, %342 : vector<8x256xf32>
    %c59 = arith.constant 59 : index
    %344 = memref.load %arg2[%c59] : memref<60xf32, #tpu.memory_space<smem>>
    %345 = vector.broadcast %344 : f32 to vector<8x256xf32>
    %346 = arith.addf %343, %345 : vector<8x256xf32>
    %cst_82 = arith.constant 0.000000e+00 : f32
    %347 = vector.broadcast %cst_82 : f32 to vector<8x256xf32>
    %348 = arith.maximumf %346, %347 : vector<8x256xf32>
    %cst_83 = arith.constant 6.000000e+00 : f32
    %349 = vector.broadcast %cst_83 : f32 to vector<8x256xf32>
    %350 = arith.minimumf %348, %349 : vector<8x256xf32>
    %351 = arith.addf %320, %6 : vector<8x256xf32>
    %cst_84 = arith.constant 0.000000e+00 : f32
    %352 = vector.broadcast %cst_84 : f32 to vector<8x256xf32>
    %353 = arith.maximumf %351, %352 : vector<8x256xf32>
    %cst_85 = arith.constant 6.000000e+00 : f32
    %354 = vector.broadcast %cst_85 : f32 to vector<8x256xf32>
    %355 = arith.minimumf %353, %354 : vector<8x256xf32>
    %c0_86 = arith.constant 0 : index
    %c6_87 = arith.constant 6 : index
    %c0_88 = arith.constant 0 : index
    %c0_89 = arith.constant 0 : index
    %356 = vector.load %arg4[%c0_86, %c6_87, %c0_88, %c0_89] : memref<1x8x8x256xf32, #tpu.memory_space<vmem>>, vector<1x1x8x256xf32>
    %357 = vector.shape_cast %356 : vector<1x1x8x256xf32> to vector<8x256xf32>
    %358 = vector.shape_cast %355 : vector<8x256xf32> to vector<1x1x8x256xf32>
    tpu.vector_store %arg4[%c0_86, %c6_87, %c0_88, %c0_89], %358 {strides = array<i32>} : memref<1x8x8x256xf32, #tpu.memory_space<vmem>>, vector<1x1x8x256xf32>,
    %359 = arith.addf %350, %6 : vector<8x256xf32>
    %cst_90 = arith.constant 0.000000e+00 : f32
    %360 = vector.broadcast %cst_90 : f32 to vector<8x256xf32>
    %361 = arith.maximumf %359, %360 : vector<8x256xf32>
    %cst_91 = arith.constant 6.000000e+00 : f32
    %362 = vector.broadcast %cst_91 : f32 to vector<8x256xf32>
    %363 = arith.minimumf %361, %362 : vector<8x256xf32>
    %c0_92 = arith.constant 0 : index
    %c7_93 = arith.constant 7 : index
    %c0_94 = arith.constant 0 : index
    %c0_95 = arith.constant 0 : index
    %364 = vector.load %arg4[%c0_92, %c7_93, %c0_94, %c0_95] : memref<1x8x8x256xf32, #tpu.memory_space<vmem>>, vector<1x1x8x256xf32>
    %365 = vector.shape_cast %364 : vector<1x1x8x256xf32> to vector<8x256xf32>
    %366 = vector.shape_cast %363 : vector<8x256xf32> to vector<1x1x8x256xf32>
    tpu.vector_store %arg4[%c0_92, %c7_93, %c0_94, %c0_95], %366 {strides = array<i32>} : memref<1x8x8x256xf32, #tpu.memory_space<vmem>>, vector<1x1x8x256xf32>,
    return
  }
  func.func @transform_0(%arg0: i32, %arg1: i32) -> i32 {
    %c0_i32 = arith.constant 0 : i32
    %c0_i32_0 = arith.constant 0 : i32
    return %c0_i32 : i32
  }
  func.func @transform_1(%arg0: i32, %arg1: i32) -> (i32, i32, i32, i32) {
    %c0_i32 = arith.constant 0 : i32
    %c0_i32_0 = arith.constant 0 : i32
    %c0_i32_1 = arith.constant 0 : i32
    return %arg0, %c0_i32, %c0_i32_0, %arg1 : i32, i32, i32, i32
  }
  func.func @transform_2(%arg0: i32, %arg1: i32) -> (i32, i32, i32, i32) {
    %c0_i32 = arith.constant 0 : i32
    %c0_i32_0 = arith.constant 0 : i32
    %c0_i32_1 = arith.constant 0 : i32
    return %arg0, %c0_i32, %c0_i32_0, %arg1 : i32, i32, i32, i32
  }
}

</mosaic_0001>

<bundles_post_ra>
// kernel: tpu_custom_call.1
= control target key start
LH: loop header
LB: loop body
LE: loop exit
PB: predicated region body
PF: predicated region fallthrough
CT: control target
= control target key end

     0   :  { %s1723_s0 = inlined_call_operand.hbm [shape: f32[60], index: 0, kind: input, shape index: {}]   ;;  %s1724_s1 = inlined_call_operand.hbm [shape: f32[2,1,8,256], index: 1, kind: input, shape index: {}]   ;;  %s1725_s2 = inlined_call_operand.hbm [shape: f32[2,8,8,256], index: 2, kind: output, shape index: {}]  }
   0x1   :  { %1729 = sst [smem:[#allocation14_spill]] %s1723_s0 }
   0x2   :  { %1730 = sst [smem:[#allocation15_spill]] %s1724_s1 }
   0x3   :  { %7 = vsyncpa [#allocation5], 0 }
   0x4   :  { %8 = vsyncpa [#allocation3], 0 }
   0x5   :  { %10 = vsyncpa [#allocation3 + $0x1], 0 }
   0x6   :  { %11 = vsyncpa [#allocation4], 0 }
   0x7   :  { %13 = vsyncpa [#allocation4 + $0x1], 0  ;;  %s1096_s9 = smov 0   ;;  %s1098_s10 = smov 0  }
   0x8   :  { %s1100_s11 = smov 0   ;;  %s1102_s12 = smov 0  }
   0x9   :  { %s1104_s13 = smov 0   ;;  %s1106_s14 = smov 0  }
   0xa LB: > { %1731 = sst [smem:[#allocation11_spill]] %s1070_s13  ;;  %s784_s15 = sadd.s32 4294967295, %s1074_s14   ;;  %s1074_s14 = sphi %s1106_s14, %s19_s14   ;;  %s1070_s13 = sphi %s1104_s13, %s1749_s13   ;;  %s1066_s12 = sphi %s1102_s12, %s1748_s12   ;;  %s1062_s11 = sphi %s1100_s11, %s1752_s11   ;;  %s1058_s10 = sphi %s1098_s10, %s1751_s10   ;;  %s1054_s9 = sphi %s1096_s9, %s1750_s9  }
   0xb   : > { %s785_s16 = sadd.s32 4294967294, %s1074_s14   ;;  %p74_p0 = scmp.ne.s32.totalorder %s1058_s10, %s1054_s9 }
   0xc   : > { %p1130_p1 = scmp.eq.s32.totalorder %s784_s15, 0  ;;  %p1134_p2 = scmp.eq.s32.totalorder %s784_s15, 1 }
   0xd   : > { %p106_p3 = scmp.eq.s32.totalorder %s785_s16, 1  ;;  %p786_p5 = scmp.ge.s32.totalorder %s1074_s14, 1 }
   0xe   : > { %p1140_p4 = por %p1130_p1, %p74_p0  ;;  %p113_p7 = scmp.lt.s32.totalorder %s1074_s14, 3 }
   0xf   : > { %p1145_p6 = por %p106_p3, %p74_p0  ;;  %s31_s22 = sadd.s32 1, %s1070_s13 }
  0x10   : > { %p1150_p8 = pnand %p786_p5, %p113_p7  ;;  %p33_p12 = scmp.ge.s32.totalorder %s31_s22, 2 }
  0x11   : > { %s1735_s20 = scalar_select %p1145_p6, 1, 0 }
  0x12   : > { %p884_p10 = pneg %p1150_p8  ;;  %s61_s23 = sadd.s32 1, %s1062_s11 }
  0x13   : > { %p68_p13 = scmp.ne.s32.totalorder %s1062_s11, %s1058_s10  ;;  %p69_p0 = scmp.eq.s32.totalorder %s1074_s14, 0 }
  0x14   : > { %p885_p11 = pnand %p884_p10, %p1130_p1  ;;  %s1076_s24 = smov [#allocation2]  }
  0x15   : > { %s1737_s0 = sld [smem:[#allocation14_spill]]  ;;  %s1754_s22 = smov (%p33_p12, %s31_s22), 0 }
  0x16   : > { %1738 = sst [smem:[#allocation12_spill]] %s1754_s22  ;;  %p1169_p3 = por %p69_p0, %p68_p13 }
  0x17   : > { %p1175_p5 = por %p1134_p2, %p68_p13  ;;  %s56_s29 = ssub.s32 %s1070_s13, %s1754_s22 }
  0x18   : > { %p897_p7 = scmp.lt.s32.totalorder %s1074_s14, 2  ;;  %p59_p10 = scmp.eq.s32.totalorder %s56_s29, 0 }
  0x19   : > { %s1740_s28 = scalar_select %p1175_p5, 1, 0 }
  0x1a   : > { %s135_s30 = sand.u32 1, %s1062_s11   ;;  %s874_s5 = sshll.u32 %s1070_s13, 8 }
  0x1b   : > { %887 = dma.hbm_to_smem (!%p885_p11), %s1737_s0, 16, %s1076_s24, [#allocation5]  }
  0x1c   : > { %s789_s3 = sshll.u32 %s135_s30, 4  ;;  %s1742_s1 = sld [smem:[#allocation15_spill]] }
  0x1d   : > { %s1184_s4 = scalar_select %p59_p10, %s1062_s11, %s61_s23  }
  0x1e   : > { %s139_s15 = scalar_lea.vmem [#allocation6], %s789_s3  ;;  %p1192_p2 = pnand %p897_p7, %p1169_p3 }
  0x1f   : > { %1741 = sst [smem:[#allocation13_spill]] %s1184_s4  ;;  %s149_s16 = sshll.u32 %s139_s15, 4  ;;  %s150_s16 = int_to_ptr.vmem [resolvable:$true] %s149_s16 }
  0x20   : > { %s136_s24 = scalar_lea.sflag [#allocation3], %s135_s30  ;;  %p964_p11 = pneg %p1192_p2 }
  0x21   : > { %s975_s25 = scalar_lea.vmem %s150_s16, 256  ;;  %s1077_s23 = smov [#allocation6]  }
  0x22   : > { %s147_s8 = scalar_lea.hbm %s1742_s1, %s874_s5  ;;  %p976_p12 = scmp.ne.s32.totalorder %s150_s16, %s975_s25 }
  0x23   : > { %s980_s26 = sshll.u32 %s1077_s23, 4  ;;  %s981_s26 = int_to_ptr.vmem [resolvable:$false] %s980_s26 }
  0x24   : > { %p978_p13 = pnand %p976_p12, %p964_p11  ;;  %s982_s29 = scalar_lea.vmem %s981_s26, 512 }
  0x25   : > { %p983_p10 = scmp.lt.s32.totalorder %s150_s16, %s981_s26  ;;  %p984_p9 = scmp.lt.s32.totalorder %s982_s29, %s975_s25 }
  0x26   : > { %p979_p0 = pneg %p978_p13 }
  0x27   : > { %p985_p6 = por %p984_p9, %p983_p10 }
  0x29   : > { %p986_p5 = pnand %p985_p6, %p979_p0 }
  0x2b   : > { %989 = shalt.err (!%p986_p5)
}
  0x2c   : > { %891 = dma.hbm_to_vmem [thread:$0]  (!%p1192_p2), %s147_s8, 256, %s150_s16, %s136_s24  }
  0x2d   : > { %158 = sbr.rel (%p1150_p8) target bundleno = 193 (0xc1), region = 28 }
  0x32   : > { %1041 = dma.done.wait (%p1130_p1), [#allocation5], 16  }
  0x33   : > { %1043 = vsyncadd (%p1130_p1), [#allocation5], 4294967280  ;;  %s1207_s27 = sand.u32 1, %s1058_s10  }
  0x34   : > { %s794_s30 = sshll.u32 %s1207_s27, 4  ;;  %s165_s3 = scalar_lea.sflag [#allocation3], %s1207_s27 }
  0x35   : > { %s168_s5 = scalar_lea.vmem [#allocation6], %s794_s30 }
  0x36   : > { %1045 = dma.done.wait (%p1140_p4), %s165_s3, 256  }
  0x37   : > { %1047 = vsyncadd (%p1140_p4), %s165_s3, 4294967040 }
  0x38   : > { %173 = sfence }
  0x39   : > { %s198_s21 = sld [smem:[#allocation2]]  ;;  %v192_v0 = vlaneseq  ;;  %v1219_v1 = vld [vmem:[%s168_s5] sm:$0xff]  ;;  %v1221_v3 = vld [vmem:[%s168_s5 + $0x8] sm:$0xff]  ;;  %s795_s3 = sshll.u32 %s1207_s27, 7 }
  0x3a   : > { %s796_s6 = sld [smem:[#allocation2 + $0x2]]  ;;  %p1744_p4 = scmp.ne.s32.totalorder %s1740_s28, 0 }
  0x3b   : > { %s797_s7 = sld [smem:[#allocation2 + $0x1]]  ;;  %v1229_v8 = vshrl.u32 %v192_v0, 7 }
  0x3c   : > { %s798_s17 = sld [smem:[#allocation2 + $0x3]] }
  0x3d   : > { %s1215_s8 = sld [smem:[#allocation2 + $0x4]]  ;;  %vm194_vm0 = vcmp.gt.s32.totalorder %v1229_v8, 0  ;;  %vm195_vm1 = vcmp.lt.s32.totalorder %v1229_v8, 7 }
  0x3e   : > { %s1217_s15 = sld [smem:[#allocation2 + $0x6]] }
  0x3f   : > { %v199_v2 = vstv %s198_s21  ;;  %s1223_s16 = sld [smem:[#allocation2 + $0x5]] }
  0x40   : > { %v200_v4 = vmul.f32 %v199_v2, %v1219_v1  ;;  %v203_v5 = vstv %s796_s6  ;;  %v201_v6 = vmul.f32 %v199_v2, %v1221_v3  ;;  %s1227_s19 = sld [smem:[#allocation2 + $0x7]] }
  0x41   : > { %v211_v7 = vstv %s797_s7  ;;  %s1231_s18 = sld [smem:[#allocation2 + $0x8]] }
  0x42   : > { %v204_v9 = vadd.f32 %v203_v5, %v200_v4  ;;  %v205_v10 = vadd.f32 %v203_v5, %v201_v6  ;;  %v212_v11 = vmul.f32 %v211_v7, %v1219_v1  ;;  %v215_v12 = vstv %s798_s17  ;;  %s1234_s24 = sld [smem:[#allocation2 + $0x9]] }
  0x43   : > { %v213_v13 = vmul.f32 %v211_v7, %v1221_v3  ;;  %v240_v14 = vstv %s1215_s8  ;;  %s1238_s25 = sld [smem:[#allocation2 + $0xa]]  ;;  %s1287_s8 = scalar_lea.vmem [#allocation7], %s795_s3 }
  0x44   : > { %v206_v15 = vmax.f32 %v204_v9, 0.0  ;;  %v207_v16 = vmax.f32 %v205_v10, 0.0  ;;  %v216_v17 = vadd.f32 %v215_v12, %v212_v11  ;;  %v241_v18 = vmul.f32 %v240_v14, %v1219_v1  ;;  %s1241_s23 = sld [smem:[#allocation2 + $0xb]] }
  0x45   : > { %v217_v19 = vadd.f32 %v215_v12, %v213_v13  ;;  %v244_v20 = vstv %s1217_s15  ;;  %v252_v21 = vstv %s1223_s16  ;;  %s1246_s26 = sld [smem:[#allocation2 + $0xc]]  ;;  %v242_v22 = vmul.f32 %v240_v14, %v1221_v3 }
  0x46   : > { %v208_v23 = vmin.f32 %v206_v15, 6.0  ;;  %v209_v24 = vmin.f32 %v207_v16, 6.0  ;;  %v218_v25 = vmax.f32 %v216_v17, 0.0  ;;  %v245_v26 = vadd.f32 %v244_v20, %v241_v18  ;;  %s1250_s29 = sld [smem:[#allocation2 + $0xd]] }
  0x47   : > { %v219_v27 = vmax.f32 %v217_v19, 0.0  ;;  %v253_v28 = vmul.f32 %v252_v21, %v1219_v1  ;;  %v256_v29 = vstv %s1227_s19  ;;  %v280_v30 = vstv %s1231_s18  ;;  %s1257_s30 = sld [smem:[#allocation2 + $0x20]] }
  0x48   : > { %v222_v31 = vadd.f32 %v208_v23, %v1219_v1  ;;  %v223_v32 = vadd.f32 %v209_v24, %v1221_v3  ;;  %v220_v33 = vmin.f32 %v218_v25, 6.0  ;;  %v247_v34 = vmax.f32 %v245_v26, 0.0  ;;  %s1264_s5 = sld [smem:[#allocation2 + $0xe]] }
  0x49   : > { %v221_v35 = vmin.f32 %v219_v27, 6.0  ;;  %v257_v36 = vadd.f32 %v256_v29, %v253_v28  ;;  %v284_v37 = vstv %s1234_s24  ;;  %v290_v38 = vstv %s1238_s25  ;;  %s1269_s21 = sld [smem:[#allocation2 + $0xf]] }
  0x4a   : > { %v224_v39 = vmax.f32 %v222_v31, 0.0  ;;  %v225_v40 = vmax.f32 %v223_v32, 0.0  ;;  %v230_v41 = vadd.f32 %v220_v33, %v1219_v1  ;;  %v1267_v42 = vmin.f32 %v247_v34, 6.0  ;;  %s1274_s6 = sld [smem:[#allocation2 + $0x10]] }
  0x4b   : > { %v231_v43 = vadd.f32 %v221_v35, %v1221_v3  ;;  %v259_v44 = vmax.f32 %v257_v36, 0.0  ;;  %v296_v45 = vstv %s1241_s23  ;;  %v300_v46 = vstv %s1246_s26  ;;  %s1277_s7 = sld [smem:[#allocation2 + $0x11]] }
  0x4c   : > { %v226_v47 = vmin.f32 %v224_v39, 6.0  ;;  %v227_v48 = vmin.f32 %v225_v40, 6.0  ;;  %v232_v49 = vmax.f32 %v230_v41, 0.0  ;;  %v263_v50 = vrot.slane %v1267_v42, 7  ;;  %s1285_s17 = sld [smem:[#allocation2 + $0x12]] }
  0x4d   : > { %v233_v51 = vmax.f32 %v231_v43, 0.0  ;;  %v1279_v52 = vmin.f32 %v259_v44, 6.0  ;;  %v271_v53 = vrot.slane %v1267_v42, 1  ;;  %v285_v54 = vmul.f32 %v284_v37, %v1267_v42  ;;  %s1313_s15 = sld [smem:[#allocation2 + $0x13]] }
  0x4e   : > { %228 = vst [vmem:[%s1287_s8] sm:$0xff] %v226_v47  ;;  %229 = vst [vmem:[%s1287_s8 + $0x8] sm:$0xff] %v227_v48  ;;  %v234_v55 = vmin.f32 %v232_v49, 6.0  ;;  %v1293_v56 = vsel %vm194_vm0, %v263_v50, 0.0  ;;  %v306_v57 = vstv %s1250_s29  ;;  %v314_v58 = vstv %s1257_s30  ;;  %s1340_s16 = sld [smem:[#allocation2 + $0x21]] }
  0x4f   : > { %v235_v59 = vmin.f32 %v233_v51, 6.0  ;;  %v267_v60 = vrot.slane %v1279_v52, 7  ;;  %v1300_v61 = vsel %vm195_vm1, %v271_v53, 0.0  ;;  %v275_v62 = vrot.slane %v1279_v52, 1  ;;  %s1354_s19 = sld [smem:[#allocation2 + $0x14]] }
  0x50   : > { %799 = vst [vmem:[%s1287_s8 + $0x10] sm:$0xff] %v234_v55  ;;  %v281_v63 = vmul.f32 %v280_v30, %v1293_v56  ;;  %v291_v0 = vmul.f32 %v290_v38, %v1300_v61  ;;  %v301_v2 = vmul.f32 %v300_v46, %v1279_v52  ;;  %v246_v4 = vadd.f32 %v244_v20, %v242_v22  ;;  %s1365_s24 = sld [smem:[#allocation2 + $0x15]] }
  0x51   : > { %800 = vst [vmem:[%s1287_s8 + $0x18] sm:$0xff] %v235_v59  ;;  %v1318_v5 = vsel %vm194_vm0, %v267_v60, 0.0  ;;  %v1322_v6 = vsel %vm195_vm1, %v275_v62, 0.0  ;;  %v254_v7 = vmul.f32 %v252_v21, %v1221_v3  ;;  %v322_v9 = vstv %s1264_s5  ;;  %s1380_s3 = sld [smem:[#allocation2 + $0x16]] }
  0x52   : > { %v287_v10 = vadd.f32 %v285_v54, %v281_v63  ;;  %v297_v11 = vmul.f32 %v296_v45, %v1318_v5  ;;  %v307_v12 = vmul.f32 %v306_v57, %v1322_v6  ;;  %v248_v13 = vmax.f32 %v246_v4, 0.0  ;;  %s1391_s18 = sld [smem:[#allocation2 + $0x17]] }
  0x53   : > { %v258_v14 = vadd.f32 %v256_v29, %v254_v7  ;;  %v323_v15 = vmul.f32 %v322_v9, %v1293_v56  ;;  %v326_v16 = vstv %s1269_s21  ;;  %v332_v17 = vstv %s1274_s6  ;;  %s1400_s25 = sld [smem:[#allocation2 + $0x18]] }
  0x54   : > { %v293_v18 = vadd.f32 %v291_v0, %v287_v10  ;;  %v303_v19 = vadd.f32 %v301_v2, %v297_v11  ;;  %v1337_v20 = vmin.f32 %v248_v13, 6.0  ;;  %v327_v21 = vmul.f32 %v326_v16, %v1267_v42  ;;  %s1404_s26 = sld [smem:[#allocation2 + $0x19]] }
  0x55   : > { %v260_v22 = vmax.f32 %v258_v14, 0.0  ;;  %v333_v23 = vmul.f32 %v332_v17, %v1300_v61  ;;  %v338_v24 = vstv %s1277_s7  ;;  %v342_v25 = vstv %s1285_s17  ;;  %s1410_s23 = sld [smem:[#allocation2 + $0x22]] }
  0x56   : > { %v309_v26 = vadd.f32 %v307_v12, %v303_v19  ;;  %v264_v27 = vrot.slane %v1337_v20, 7  ;;  %v272_v28 = vrot.slane %v1337_v20, 1  ;;  %v286_v29 = vmul.f32 %v284_v37, %v1337_v20  ;;  %s1420_s29 = sld [smem:[#allocation2 + $0x1a]] }
  0x57   : > { %v1350_v31 = vmin.f32 %v260_v22, 6.0  ;;  %v329_v32 = vadd.f32 %v327_v21, %v323_v15  ;;  %v339_v33 = vmul.f32 %v338_v24, %v1318_v5  ;;  %v343_v34 = vmul.f32 %v342_v25, %v1279_v52  ;;  %s1425_s5 = sld [smem:[#allocation2 + $0x1b]] }
  0x58   : > { %v311_v35 = vadd.f32 %v309_v26, %v293_v18  ;;  %v1358_v36 = vsel %vm194_vm0, %v264_v27, 0.0  ;;  %v1362_v39 = vsel %vm195_vm1, %v272_v28, 0.0  ;;  %v348_v37 = vstv %s1313_s15  ;;  %s1429_s21 = sld [smem:[#allocation2 + $0x1c]] }
  0x59   : > { %v268_v40 = vrot.slane %v1350_v31, 7  ;;  %v276_v41 = vrot.slane %v1350_v31, 1  ;;  %v282_v43 = vmul.f32 %v280_v30, %v1358_v36  ;;  %v292_v44 = vmul.f32 %v290_v38, %v1362_v39  ;;  %s1434_s30 = sld [smem:[#allocation2 + $0x1d]] }
  0x5a   : > { %v315_v47 = vadd.f32 %v314_v58, %v311_v35  ;;  %v302_v48 = vmul.f32 %v300_v46, %v1350_v31  ;;  %v335_v49 = vadd.f32 %v333_v23, %v329_v32  ;;  %v345_v50 = vadd.f32 %v343_v34, %v339_v33  ;;  %s1439_s6 = sld [smem:[#allocation2 + $0x1e]] }
  0x5b   : > { %v1384_v51 = vsel %vm194_vm0, %v268_v40, 0.0  ;;  %v1388_v53 = vsel %vm195_vm1, %v276_v41, 0.0  ;;  %v288_v30 = vadd.f32 %v286_v29, %v282_v43  ;;  %v349_v38 = vmul.f32 %v348_v37, %v1322_v6  ;;  %s1443_s7 = sld [smem:[#allocation2 + $0x1f]] }
  0x5c   : > { %v317_v54 = vmax.f32 %v315_v47, 0.0  ;;  %v298_v46 = vmul.f32 %v296_v45, %v1384_v51  ;;  %v308_v55 = vmul.f32 %v306_v57, %v1388_v53  ;;  %v356_v59 = vstv %s1340_s16  ;;  %s1447_s17 = sld [smem:[#allocation2 + $0x23]] }
  0x5d   : > { %v294_v60 = vadd.f32 %v292_v44, %v288_v30  ;;  %v351_v62 = vadd.f32 %v349_v38, %v345_v50  ;;  %v324_v63 = vmul.f32 %v322_v9, %v1358_v36  ;;  %v328_v0 = vmul.f32 %v326_v16, %v1337_v20  ;;  %s1457_s15 = sld [smem:[#allocation2 + $0x24]] }
  0x5e   : > { %v319_v2 = vmin.f32 %v317_v54, 6.0  ;;  %v304_v4 = vadd.f32 %v302_v48, %v298_v46  ;;  %v334_v45 = vmul.f32 %v332_v17, %v1362_v39  ;;  %v340_v7 = vmul.f32 %v338_v24, %v1384_v51  ;;  %s1463_s16 = sld [smem:[#allocation2 + $0x25]] }
  0x5f   : > { %v353_v57 = vadd.f32 %v351_v62, %v335_v49  ;;  %v330_v10 = vadd.f32 %v328_v0, %v324_v63  ;;  %v344_v11 = vmul.f32 %v342_v25, %v1350_v31  ;;  %v350_v12 = vmul.f32 %v348_v37, %v1388_v53  ;;  %s1532_s0 = sld [smem:[#allocation2 + $0x36]] }
  0x60   : > { %v447_v9 = vadd.f32 %v319_v2, %v1219_v1  ;;  %v310_v13 = vadd.f32 %v308_v55, %v304_v4  ;;  %v364_v14 = vstv %s1354_s19  ;;  %v368_v15 = vstv %s1365_s24  ;;  %s1468_s19 = sld [smem:[#allocation2 + $0x26]] }
  0x61   : > { %v357_v16 = vadd.f32 %v356_v59, %v353_v57  ;;  %v336_v17 = vadd.f32 %v334_v45, %v330_v10  ;;  %v346_v18 = vadd.f32 %v344_v11, %v340_v7  ;;  %v365_v19 = vmul.f32 %v364_v14, %v1293_v56  ;;  %s1472_s24 = sld [smem:[#allocation2 + $0x27]] }
  0x62   : > { %v449_v21 = vmax.f32 %v447_v9, 0.0  ;;  %v312_v22 = vadd.f32 %v310_v13, %v294_v60  ;;  %v369_v23 = vmul.f32 %v368_v15, %v1267_v42  ;;  %v374_v24 = vstv %s1380_s3  ;;  %s1475_s3 = sld [smem:[#allocation2 + $0x28]] }
  0x63   : > { %v359_v25 = vmax.f32 %v357_v16, 0.0  ;;  %v352_v26 = vadd.f32 %v350_v12, %v346_v18  ;;  %v375_v27 = vmul.f32 %v374_v24, %v1300_v61  ;;  %v380_v28 = vstv %s1391_s18  ;;  %s1481_s18 = sld [smem:[#allocation2 + $0x29]] }
  0x64   : > { %v451_v29 = vmin.f32 %v449_v21, 6.0  ;;  %v316_v32 = vadd.f32 %v314_v58, %v312_v22  ;;  %v371_v33 = vadd.f32 %v369_v23, %v365_v19  ;;  %v381_v34 = vmul.f32 %v380_v28, %v1318_v5  ;;  %s1542_s1 = sld [smem:[#allocation2 + $0x37]] }
  0x65   : > { %v361_v35 = vmin.f32 %v359_v25, 6.0  ;;  %v354_v37 = vadd.f32 %v352_v26, %v336_v17  ;;  %v384_v40 = vstv %s1400_s25  ;;  %v390_v41 = vstv %s1404_s26  ;;  %s1486_s25 = sld [smem:[#allocation2 + $0x2a]] }
  0x66   : > { %833 = vst [vmem:[%s1287_s8 + $0x20] sm:$0xff] %v451_v29  ;;  %v318_v43 = vmax.f32 %v316_v32, 0.0  ;;  %v377_v44 = vadd.f32 %v375_v27, %v371_v33  ;;  %v385_v47 = vmul.f32 %v384_v40, %v1279_v52  ;;  %v391_v48 = vmul.f32 %v390_v41, %v1322_v6  ;;  %s1490_s26 = sld [smem:[#allocation2 + $0x2b]] }
  0x67   : > { %v456_v58 = vadd.f32 %v361_v35, %v1219_v1  ;;  %v358_v49 = vadd.f32 %v356_v59, %v354_v37  ;;  %v398_v50 = vstv %s1410_s23  ;;  %v366_v30 = vmul.f32 %v364_v14, %v1358_v36  ;;  %s1493_s23 = sld [smem:[#allocation2 + $0x2c]] }
  0x68   : > { %v320_v38 = vmin.f32 %v318_v43, 6.0  ;;  %v387_v54 = vadd.f32 %v385_v47, %v381_v34  ;;  %v370_v46 = vmul.f32 %v368_v15, %v1337_v20  ;;  %v376_v55 = vmul.f32 %v374_v24, %v1362_v39  ;;  %s1546_s22 = sld [smem:[#allocation2 + $0x38]] }
  0x69   : > { %v458_v60 = vmax.f32 %v456_v58, 0.0  ;;  %v360_v62 = vmax.f32 %v358_v49, 0.0  ;;  %v382_v63 = vmul.f32 %v380_v28, %v1384_v51  ;;  %v386_v59 = vmul.f32 %v384_v40, %v1350_v31  ;;  %s1548_s13 = sld [smem:[#allocation2 + $0x39]] }
  0x6a   : > { %v448_v0 = vadd.f32 %v320_v38, %v1221_v3  ;;  %v393_v2 = vadd.f32 %v391_v48, %v387_v54  ;;  %v372_v4 = vadd.f32 %v370_v46, %v366_v30  ;;  %v392_v45 = vmul.f32 %v390_v41, %v1388_v53  ;;  %s1578_s4 = sld [smem:[#allocation2 + $0x3a]] }
  0x6b   : > { %v460_v7 = vmin.f32 %v458_v60, 6.0  ;;  %v362_v57 = vmin.f32 %v360_v62, 6.0  ;;  %v388_v10 = vadd.f32 %v386_v59, %v382_v63  ;;  %v406_v11 = vstv %s1420_s29  ;;  %s1497_s29 = sld [smem:[#allocation2 + $0x2d]] }
  0x6c   : > { %v450_v12 = vmax.f32 %v448_v0, 0.0  ;;  %v395_v9 = vadd.f32 %v393_v2, %v377_v44  ;;  %v378_v13 = vadd.f32 %v376_v55, %v372_v4  ;;  %v407_v14 = vmul.f32 %v406_v11, %v1293_v56 }
  0x6d   : > { %835 = vst [vmem:[%s1287_s8 + $0x30] sm:$0xff] %v460_v7  ;;  %v457_v15 = vadd.f32 %v362_v57, %v1221_v3  ;;  %v394_v16 = vadd.f32 %v392_v45, %v388_v10  ;;  %v410_v17 = vstv %s1425_s5  ;;  %v416_v18 = vstv %s1429_s21  ;;  %s1499_s5 = sld [smem:[#allocation2 + $0x2e]] }
  0x6e   : > { %v452_v19 = vmin.f32 %v450_v12, 6.0  ;;  %v399_v21 = vadd.f32 %v398_v50, %v395_v9  ;;  %v411_v22 = vmul.f32 %v410_v17, %v1267_v42  ;;  %v417_v23 = vmul.f32 %v416_v18, %v1300_v61  ;;  %s1501_s21 = sld [smem:[#allocation2 + $0x2f]] }
  0x6f   : > { %v459_v24 = vmax.f32 %v457_v15, 0.0  ;;  %v396_v25 = vadd.f32 %v394_v16, %v378_v13  ;;  %v422_v56 = vstv %s1434_s30  ;;  %v426_v26 = vstv %s1439_s6  ;;  %s1504_s30 = sld [smem:[#allocation2 + $0x30]] }
  0x70   : > { %834 = vst [vmem:[%s1287_s8 + $0x28] sm:$0xff] %v452_v19  ;;  %v401_v27 = vmax.f32 %v399_v21, 0.0  ;;  %v413_v28 = vadd.f32 %v411_v22, %v407_v14  ;;  %v423_v29 = vmul.f32 %v422_v56, %v1318_v5  ;;  %v427_v32 = vmul.f32 %v426_v26, %v1279_v52  ;;  %s1507_s6 = sld [smem:[#allocation2 + $0x31]] }
  0x71   : > { %v461_v42 = vmin.f32 %v459_v24, 6.0  ;;  %v400_v33 = vadd.f32 %v398_v50, %v396_v25  ;;  %v432_v34 = vstv %s1443_s7  ;;  %v440_v61 = vstv %s1447_s17  ;;  %s1510_s7 = sld [smem:[#allocation2 + $0x32]] }
  0x72   : > { %v403_v35 = vmin.f32 %v401_v27, 6.0  ;;  %v419_v37 = vadd.f32 %v417_v23, %v413_v28  ;;  %v429_v40 = vadd.f32 %v427_v32, %v423_v29  ;;  %v433_v41 = vmul.f32 %v432_v34, %v1322_v6  ;;  %s1517_s17 = sld [smem:[#allocation2 + $0x33]] }
  0x73   : > { %836 = vst [vmem:[%s1287_s8 + $0x38] sm:$0xff] %v461_v42  ;;  %v402_v5 = vmax.f32 %v400_v33, 0.0  ;;  %v408_v52 = vmul.f32 %v406_v11, %v1358_v36  ;;  %v412_v43 = vmul.f32 %v410_v17, %v1337_v20  ;;  %v418_v44 = vmul.f32 %v416_v18, %v1362_v39 }
  0x74   : > { %v465_v47 = vadd.f32 %v403_v35, %v1219_v1  ;;  %v435_v48 = vadd.f32 %v433_v41, %v429_v40  ;;  %v424_v58 = vmul.f32 %v422_v56, %v1384_v51  ;;  %v428_v6 = vmul.f32 %v426_v26, %v1350_v31 }
  0x75   : > { %v404_v49 = vmin.f32 %v402_v5, 6.0  ;;  %v414_v50 = vadd.f32 %v412_v43, %v408_v52  ;;  %v434_v36 = vmul.f32 %v432_v34, %v1388_v53  ;;  %v484_v30 = vstv %s1457_s15  ;;  %s1520_s15 = sld [smem:[#allocation2 + $0x34]] }
  0x76   : > { %v467_v20 = vmax.f32 %v465_v47, 0.0  ;;  %v437_v39 = vadd.f32 %v435_v48, %v419_v37  ;;  %v430_v38 = vadd.f32 %v428_v6, %v424_v58  ;;  %v485_v54 = vmul.f32 %v484_v30, %v1219_v1 }
  0x77   : > { %v466_v51 = vadd.f32 %v404_v49, %v1221_v3  ;;  %v420_v31 = vadd.f32 %v418_v44, %v414_v50  ;;  %v488_v46 = vstv %s1463_s16  ;;  %v508_v45 = vstv %s1472_s24  ;;  %s1526_s16 = sld [smem:[#allocation2 + $0x35]]  ;;  %s670_s24 = scalar_lea.sflag [#allocation4], %s1207_s27 }
  0x78   : > { %v469_v55 = vmin.f32 %v467_v20, 6.0  ;;  %v441_v53 = vadd.f32 %v440_v61, %v437_v39  ;;  %v436_v60 = vadd.f32 %v434_v36, %v430_v38  ;;  %v489_v62 = vadd.f32 %v488_v46, %v485_v54 }
  0x79   : > { %v468_v63 = vmax.f32 %v466_v51, 0.0  ;;  %v532_v11 = vstv %s1486_s25  ;;  %v504_v12 = vstv %s1468_s19  ;;  %v514_v9 = vstv %s1475_s3  ;;  %s1610_s19 = sld [smem:[#allocation2 + $0x3b]] }
  0x7a   : > { %837 = vst [vmem:[%s1287_s8 + $0x40] sm:$0xff] %v469_v55  ;;  %v443_v59 = vmax.f32 %v441_v53, 0.0  ;;  %v438_v0 = vadd.f32 %v436_v60, %v420_v31  ;;  %v491_v2 = vmax.f32 %v489_v62, 0.0  ;;  %v528_v13 = vstv %s1481_s18 }
  0x7b   : > { %v470_v4 = vmin.f32 %v468_v63, 6.0  ;;  %v538_v14 = vstv %s1490_s26  ;;  %v486_v42 = vmul.f32 %v484_v30, %v1221_v3  ;;  %v520_v35 = vstv %s1493_s23 }
  0x7c   : > { %v445_v7 = vmin.f32 %v443_v59, 6.0  ;;  %v442_v57 = vadd.f32 %v440_v61, %v438_v0  ;;  %v493_v10 = vmin.f32 %v491_v2, 6.0  ;;  %v544_v37 = vstv %s1497_s29 }
  0x7d   : > { %838 = vst [vmem:[%s1287_s8 + $0x48] sm:$0xff] %v470_v4  ;;  %v490_v40 = vadd.f32 %v488_v46, %v486_v42  ;;  %v568_v43 = vstv %s1499_s5  ;;  %v572_v58 = vstv %s1501_s21  ;;  %v578_v6 = vstv %s1504_s30 }
  0x7e   : > { %v474_v15 = vadd.f32 %v445_v7, %v1219_v1  ;;  %v444_v16 = vmax.f32 %v442_v57, 0.0  ;;  %v495_v17 = vrot.slane %v493_v10, 7  ;;  %v499_v18 = vrot.slane %v493_v10, 1 }
  0x7f   : > { %v509_v19 = vmul.f32 %v508_v45, %v493_v10  ;;  %v533_v21 = vmul.f32 %v532_v11, %v493_v10  ;;  %v492_v44 = vmax.f32 %v490_v40, 0.0  ;;  %v584_v49 = vstv %s1507_s6 }
  0x80   : > { %v476_v22 = vmax.f32 %v474_v15, 0.0  ;;  %v446_v23 = vmin.f32 %v444_v16, 6.0  ;;  %v497_v24 = vsel %vm194_vm0, %v495_v17, 0.0  ;;  %v501_v25 = vsel %vm195_vm1, %v499_v18, 0.0 }
  0x81   : > { %v505_v56 = vmul.f32 %v504_v12, %v497_v24  ;;  %v515_v26 = vmul.f32 %v514_v9, %v501_v25  ;;  %v529_v27 = vmul.f32 %v528_v13, %v497_v24  ;;  %v539_v28 = vmul.f32 %v538_v14, %v501_v25 }
  0x82   : > { %v478_v29 = vmin.f32 %v476_v22, 6.0  ;;  %v475_v32 = vadd.f32 %v446_v23, %v1221_v3  ;;  %v588_v50 = vstv %s1510_s7  ;;  %v594_v36 = vstv %s1517_s17 }
  0x83   : > { %v511_v33 = vadd.f32 %v509_v19, %v505_v56  ;;  %v535_v34 = vadd.f32 %v533_v21, %v529_v27  ;;  %v494_v30 = vmin.f32 %v492_v44, 6.0  ;;  %v610_v38 = vstv %s1520_s15 }
  0x84   : > { %839 = vst [vmem:[%s1287_s8 + $0x50] sm:$0xff] %v478_v29  ;;  %v477_v61 = vmax.f32 %v475_v32, 0.0  ;;  %v614_v54 = vstv %s1526_s16  ;;  %v620_v46 = vstv %s1532_s0  ;;  %v626_v55 = vstv %s1542_s1  ;;  %s875_s0 = sshll.u32 %s1066_s12, 11  ;;  %s685_s1 = sshll.u32 %s1287_s8, 4  ;;  %s1673_s1 = int_to_ptr.vmem [resolvable:$true] %s685_s1 }
  0x85   : > { %v517_v41 = vadd.f32 %v515_v26, %v511_v33  ;;  %v541_v5 = vadd.f32 %v539_v28, %v535_v34  ;;  %v496_v51 = vrot.slane %v494_v30, 7  ;;  %v500_v31 = vrot.slane %v494_v30, 1  ;;  %s990_s3 = scalar_lea.vmem %s1673_s1, 2048  ;;  %s1078_s12 = smov [#allocation7]  }
  0x86   : > { %v479_v52 = vmin.f32 %v477_v61, 6.0  ;;  %v630_v62 = vstv %s1546_s22  ;;  %v636_v63 = vstv %s1548_s13  ;;  %v510_v2 = vmul.f32 %v508_v45, %v494_v30  ;;  %p991_p1 = scmp.ne.s32.totalorder %s1673_s1, %s990_s3  ;;  %s994_s18 = sshll.u32 %s1078_s12, 4  ;;  %s995_s18 = int_to_ptr.vmem [resolvable:$false] %s994_s18 }
  0x87   : > { %v521_v47 = vadd.f32 %v520_v35, %v517_v41  ;;  %v545_v48 = vadd.f32 %v544_v37, %v541_v5  ;;  %v498_v59 = vsel %vm194_vm0, %v496_v51, 0.0  ;;  %v502_v0 = vsel %vm195_vm1, %v500_v31, 0.0  ;;  %s996_s25 = scalar_lea.vmem %s995_s18, 4096  ;;  %p997_p9 = scmp.lt.s32.totalorder %s1673_s1, %s995_s18 }
  0x88   : > { %840 = vst [vmem:[%s1287_s8 + $0x58] sm:$0xff] %v479_v52  ;;  %v534_v4 = vmul.f32 %v532_v11, %v494_v30  ;;  %v506_v45 = vmul.f32 %v504_v12, %v498_v59  ;;  %v516_v18 = vmul.f32 %v514_v9, %v502_v0  ;;  %v530_v56 = vmul.f32 %v528_v13, %v498_v59  ;;  %p992_p6 = pnand %p991_p1, %p1744_p4  ;;  %p998_p3 = scmp.lt.s32.totalorder %s996_s25, %s990_s3 }
  0x89   : > { %v523_v20 = vmax.f32 %v521_v47, 0.0  ;;  %v547_v39 = vmax.f32 %v545_v48, 0.0  ;;  %v540_v26 = vmul.f32 %v538_v14, %v502_v0  ;;  %v602_v52 = vstv %s1578_s4  ;;  %s1671_s4 = scalar_lea.hbm %s1725_s2, %s875_s0 }
  0x8a   : > { %v512_v25 = vadd.f32 %v510_v2, %v506_v45  ;;  %v536_v34 = vadd.f32 %v534_v4, %v530_v56  ;;  %v644_v2 = vstv %s1610_s19  ;;  %p993_p8 = pneg %p992_p6  ;;  %p999_p5 = por %p998_p3, %p997_p9 }
  0x8b   : > { %v525_v53 = vmin.f32 %v523_v20, 6.0  ;;  %v549_v60 = vmin.f32 %v547_v39, 6.0 }
  0x8c   : > { %v518_v33 = vadd.f32 %v516_v18, %v512_v25  ;;  %v542_v47 = vadd.f32 %v540_v26, %v536_v34  ;;  %p1000_p7 = pnand %p999_p5, %p993_p8 }
  0x8d   : > { %v551_v7 = vrot.slane %v525_v53, 7  ;;  %v555_v57 = vrot.slane %v549_v60, 7  ;;  %v559_v10 = vrot.slane %v525_v53, 1  ;;  %v563_v15 = vrot.slane %v549_v60, 1 }
  0x8e   : > { %v573_v16 = vmul.f32 %v572_v58, %v525_v53  ;;  %v589_v17 = vmul.f32 %v588_v50, %v549_v60  ;;  %v615_v32 = vmul.f32 %v614_v54, %v525_v53  ;;  %v631_v13 = vmul.f32 %v630_v62, %v549_v60 }
  0x8f   : > { %v553_v11 = vsel %vm194_vm0, %v551_v7, 0.0  ;;  %v557_v19 = vsel %vm194_vm0, %v555_v57, 0.0  ;;  %v561_v21 = vsel %vm195_vm1, %v559_v10, 0.0  ;;  %v565_v22 = vsel %vm195_vm1, %v563_v15, 0.0 }
  0x90   : > { %v569_v23 = vmul.f32 %v568_v43, %v553_v11  ;;  %v579_v12 = vmul.f32 %v578_v6, %v561_v21  ;;  %v585_v9 = vmul.f32 %v584_v49, %v557_v19  ;;  %v595_v24 = vmul.f32 %v594_v36, %v565_v22 }
  0x91   : > { %v611_v27 = vmul.f32 %v610_v38, %v553_v11  ;;  %v621_v42 = vmul.f32 %v620_v46, %v561_v21  ;;  %v627_v61 = vmul.f32 %v626_v55, %v557_v19  ;;  %v637_v5 = vmul.f32 %v636_v63, %v565_v22 }
  0x92   : > { %v575_v28 = vadd.f32 %v573_v16, %v569_v23  ;;  %v591_v29 = vadd.f32 %v589_v17, %v585_v9  ;;  %v522_v44 = vadd.f32 %v520_v35, %v518_v33  ;;  %v546_v51 = vadd.f32 %v544_v37, %v542_v47 }
  0x93   : > { %v617_v41 = vadd.f32 %v615_v32, %v611_v27  ;;  %v633_v48 = vadd.f32 %v631_v13, %v627_v61 }
  0x94   : > { %v581_v40 = vadd.f32 %v579_v12, %v575_v28  ;;  %v597_v14 = vadd.f32 %v595_v24, %v591_v29  ;;  %v524_v39 = vmax.f32 %v522_v44, 0.0  ;;  %v548_v59 = vmax.f32 %v546_v51, 0.0 }
  0x95   : > { %v623_v20 = vadd.f32 %v621_v42, %v617_v41  ;;  %v639_v31 = vadd.f32 %v637_v5, %v633_v48 }
  0x96   : > { %v599_v30 = vadd.f32 %v597_v14, %v581_v40  ;;  %v526_v60 = vmin.f32 %v524_v39, 6.0  ;;  %v550_v35 = vmin.f32 %v548_v59, 6.0 }
  0x97   : > { %v641_v0 = vadd.f32 %v639_v31, %v623_v20 }
  0x98   : > { %v603_v53 = vadd.f32 %v602_v52, %v599_v30  ;;  %v552_v7 = vrot.slane %v526_v60, 7  ;;  %v560_v57 = vrot.slane %v526_v60, 1  ;;  %v574_v15 = vmul.f32 %v572_v58, %v526_v60 }
  0x99   : > { %v645_v16 = vadd.f32 %v644_v2, %v641_v0  ;;  %v616_v37 = vmul.f32 %v614_v54, %v526_v60  ;;  %v556_v45 = vrot.slane %v550_v35, 7  ;;  %v564_v11 = vrot.slane %v550_v35, 1 }
  0x9a   : > { %v605_v4 = vmax.f32 %v603_v53, 0.0  ;;  %v554_v17 = vsel %vm194_vm0, %v552_v7, 0.0  ;;  %v562_v18 = vsel %vm195_vm1, %v560_v57, 0.0  ;;  %v590_v22 = vmul.f32 %v588_v50, %v550_v35 }
  0x9b   : > { %v570_v21 = vmul.f32 %v568_v43, %v554_v17  ;;  %v580_v58 = vmul.f32 %v578_v6, %v562_v18  ;;  %v558_v54 = vsel %vm194_vm0, %v556_v45, 0.0  ;;  %v566_v23 = vsel %vm195_vm1, %v564_v11, 0.0 }
  0x9c   : > { %v607_v10 = vmin.f32 %v605_v4, 6.0  ;;  %v647_v12 = vmax.f32 %v645_v16, 0.0  ;;  %v612_v9 = vmul.f32 %v610_v38, %v554_v17  ;;  %v586_v43 = vmul.f32 %v584_v49, %v558_v54 }
  0x9d   : > { %v576_v25 = vadd.f32 %v574_v15, %v570_v21  ;;  %v596_v6 = vmul.f32 %v594_v36, %v566_v23  ;;  %v622_v26 = vmul.f32 %v620_v46, %v562_v18  ;;  %v628_v27 = vmul.f32 %v626_v55, %v558_v54 }
  0x9e   : > { %v651_v19 = vadd.f32 %v607_v10, %v1219_v1  ;;  %v649_v56 = vmin.f32 %v647_v12, 6.0  ;;  %v618_v50 = vadd.f32 %v616_v37, %v612_v9  ;;  %v592_v29 = vadd.f32 %v590_v22, %v586_v43 }
  0x9f   : > { %v582_v8 = vadd.f32 %v580_v58, %v576_v25  ;;  %v632_v32 = vmul.f32 %v630_v62, %v550_v35  ;;  %v638_v42 = vmul.f32 %v636_v63, %v566_v23 }
  0xa0   : > { %v653_v24 = vmax.f32 %v651_v19, 0.0  ;;  %v660_v38 = vadd.f32 %v649_v56, %v1219_v1  ;;  %v598_v49 = vadd.f32 %v596_v6, %v592_v29  ;;  %v624_v33 = vadd.f32 %v622_v26, %v618_v50 }
  0xa1   : > { %v634_v36 = vadd.f32 %v632_v32, %v628_v27 }
  0xa2   : > { %v655_v28 = vmin.f32 %v653_v24, 6.0  ;;  %v662_v34 = vmax.f32 %v660_v38, 0.0  ;;  %v600_v46 = vadd.f32 %v598_v49, %v582_v8 }
  0xa3   : > { %v640_v61 = vadd.f32 %v638_v42, %v634_v36 }
  0xa4   : > { %865 = vst [vmem:[%s1287_s8 + $0x60] sm:$0xff] %v655_v28  ;;  %v664_v55 = vmin.f32 %v662_v34, 6.0  ;;  %v604_v13 = vadd.f32 %v602_v52, %v600_v46 }
  0xa5   : > { %v642_v40 = vadd.f32 %v640_v61, %v624_v33 }
  0xa6   : > { %867 = vst [vmem:[%s1287_s8 + $0x70] sm:$0xff] %v664_v55  ;;  %v606_v14 = vmax.f32 %v604_v13, 0.0 }
  0xa7   : > { %v646_v62 = vadd.f32 %v644_v2, %v642_v40 }
  0xa8   : > { %v608_v1 = vmin.f32 %v606_v14, 6.0 }
  0xa9   : > { %v648_v63 = vmax.f32 %v646_v62, 0.0 }
  0xaa   : > { %v652_v41 = vadd.f32 %v608_v1, %v1221_v3 }
  0xab   : > { %v650_v5 = vmin.f32 %v648_v63, 6.0 }
  0xac   : > { %v654_v44 = vmax.f32 %v652_v41, 0.0 }
  0xad   : > { %v661_v47 = vadd.f32 %v650_v5, %v1221_v3 }
  0xae   : > { %v656_v48 = vmin.f32 %v654_v44, 6.0 }
  0xaf   : > { %v663_v52 = vmax.f32 %v661_v47, 0.0 }
  0xb0   : > { %866 = vst [vmem:[%s1287_s8 + $0x68] sm:$0xff] %v656_v48 }
  0xb1   : > { %v665_v30 = vmin.f32 %v663_v52, 6.0 }
  0xb3   : > { %868 = vst [vmem:[%s1287_s8 + $0x78] sm:$0xff] %v665_v30 }
  0xb4   : > { %1003 = shalt.err (!%p1000_p7)
}
  0xb5   : > { %s1004_s8 = scalar_lea.hbm %s1671_s4, 2048  ;;  %s1008_s29 = scalar_lea.hbm %s1725_s2, 4096 }
  0xb6   : > { %p1005_p2 = scmp.ne.s32.totalorder %s1671_s4, %s1004_s8  ;;  %p1009_p13 = scmp.lt.s32.totalorder %s1671_s4, %s1725_s2 }
  0xb7   : > { %p1010_p0 = scmp.lt.s32.totalorder %s1008_s29, %s1004_s8 }
  0xb8   : > { %p1006_p11 = pnand %p1005_p2, %p1744_p4 }
  0xb9   : > { %p1011_p10 = por %p1010_p0, %p1009_p13 }
  0xba   : > { %p1007_p12 = pneg %p1006_p11 }
  0xbc   : > { %p1012_p1 = pnand %p1011_p10, %p1007_p12 }
  0xbe   : > { %1015 = shalt.err (!%p1012_p1)
}
  0xbf   : > { %s1079_s30 = smov 256   ;;  %s1080_s6 = smov 16  }
  0xc0   : > { %882 = dma.vmem_to_hbm [thread:$0]  (%p1744_p4), %s1673_s1, 2048, %s1671_s4, %s670_s24, %s1079_s30, %s1079_s30, %s1080_s6  }
  0xc1 PF: > { %s700_s7 = sand.u32 1, %s1054_s9   ;;  %p1745_p6 = scmp.ne.s32.totalorder %s1735_s20, 0 }
  0xc2   : > { %p1746_p8 = scmp.ge.s32.totalorder %s1074_s14, 2  ;;  %s701_s17 = scalar_lea.sflag [#allocation4], %s700_s7 }
  0xc4   : > { %p893_p9 = pnand %p1746_p8, %p1745_p6 }
  0xc6   : > { %p894_p3 = pneg %p893_p9 }
  0xc8   : > { %1049 = dma.done.wait (%p894_p3), %s701_s17, 2048  }
  0xc9   : > { %1051 = vsyncadd (%p894_p3), %s701_s17, 4294965248  ;;  %s19_s14 = sadd.s32 1, %s1074_s14   ;;  %s1747_s28 = sld [smem:[#allocation13_spill]] }
  0xca   : > { %p16_p5 = scmp.ge.s32.totalorder %s19_s14, 4   ;;  %s1748_s12 = sld [smem:[#allocation11_spill]] }
  0xcb   : > { %s1749_s13 = sld [smem:[#allocation12_spill]]  ;;  %s1750_s9 = smov %s1058_s10 }
  0xcc   : > { %s1751_s10 = smov %s1062_s11  ;;  %18 = sbr.rel (!%p16_p5) target bundleno = 10 (0xa), region = 85 }
  0xcf   : > { %s1752_s11 = smov %s1747_s28 }
  0xd1   :  { %706 = vsyncpa [#allocation3], 1 }
  0xd2   :  { %708 = vsyncpa [#allocation3 + $0x1], 1 }
  0xd3   :  { %709 = vsyncpa [#allocation4], 1 }
  0xd4   :  { %711 = vsyncpa [#allocation4 + $0x1], 1 }
  0xd5   :  { %712 = vsyncpa [#allocation5], 1 }
  0xd6   :  { %714 = vsyncpa [#allocation5 + $0x1], 1 }

</bundles_post_ra>
